<compile_context>
chip_gen: v6e
topology: v6e:2x2x1
jax: 0.10.0
libtpu: 0.0.40
codegen_flags: <defaults>
</compile_context>

<pallas_src>
import jax
import jax.numpy as jnp
from jax.experimental import pallas as pl
from jax.experimental.pallas import tpu as pltpu

_EPS = 1e-5
_N3_MM_PAD = 128   # fc3 matmul width padded to a full lane width (MXU-dense)
_N_OUT_PAD = 16    # output array width (only 9 real lanes; masked stores OK)


def _round_up(n, m):
    return ((n + m - 1) // m) * m


def _cdiv(a, b):
    return -(-a // b)


# ---------------------------------------------------------------------------
# Kernel: one batch tile through the whole (BN-folded) MLP.
# ---------------------------------------------------------------------------
def transformation_kernel(x_ref, w1_ref, b1_ref, w2_ref, b2_ref, w3_ref, b3_ref,
                          o_ref):
    x = x_ref[...]
    if x.dtype != jnp.bfloat16:          # trace-time branch; no cast if bf16 in
        x = x.astype(jnp.bfloat16)

    # fc1 (+folded bn1) + relu   (dropout = identity in eval mode)
    h = jnp.dot(x, w1_ref[...], preferred_element_type=jnp.float32) + b1_ref[...]
    h = jnp.maximum(h, 0.0)

    # fc2 (+folded bn2) + relu   (dropout = identity in eval mode)
    h = jnp.dot(h.astype(jnp.bfloat16), w2_ref[...],
                preferred_element_type=jnp.float32) + b2_ref[...]
    h = jnp.maximum(h, 0.0)

    # fc3 (+folded bn3, zero-padded to 128 lanes for the MXU) + tanh
    h = jnp.dot(h.astype(jnp.bfloat16), w3_ref[...],
                preferred_element_type=jnp.float32) + b3_ref[...]

    # Only the first _N_OUT_PAD lanes are stored (tiny masked store, 8x less
    # HBM write traffic than storing the full 128-lane pad).
    o_ref[...] = jnp.tanh(h[:, :_N_OUT_PAD])


# ---------------------------------------------------------------------------
# Host-side parameter prep: fold eval-mode BN into W/b, cast W to bf16,
# pad fc3 to a lane-dense 128 columns.
# ---------------------------------------------------------------------------
def _fold_bn(w, b, gamma, beta, mean, var):
    scale = gamma * jax.lax.rsqrt(var + _EPS)          # (1, out)
    w_f = (w * scale).astype(jnp.bfloat16)             # (in, out) bf16
    b_f = ((b - mean) * scale + beta).astype(jnp.float32)
    return w_f, b_f


def prepare_inference_params(params):
    (w1, b1, g1, bt1, m1, v1,
     w2, b2, g2, bt2, m2, v2,
     w3, b3, g3, bt3, m3, v3) = params
    w1f, b1f = _fold_bn(w1, b1, g1, bt1, m1, v1)
    w2f, b2f = _fold_bn(w2, b2, g2, bt2, m2, v2)
    w3f, b3f = _fold_bn(w3, b3, g3, bt3, m3, v3)
    # pad fc3 out-dim 9 -> 128 (tanh(0)=0 in padded lanes; sliced off later)
    n3 = w3f.shape[1]
    w3p = jnp.zeros((w3f.shape[0], _N3_MM_PAD), jnp.bfloat16).at[:, :n3].set(w3f)
    b3p = jnp.zeros((1, _N3_MM_PAD), jnp.float32).at[:, :n3].set(b3f)
    return w1f, b1f, w2f, b2f, w3p, b3p


# ---------------------------------------------------------------------------
# Wrapper
# ---------------------------------------------------------------------------
def transformation_forward(x, params, *, tile_b=1024):
    """x: (B, 1024) float32 or bfloat16 -> (B, 9) float32 (eval-mode)."""
    B = x.shape[0]
    w1, b1, w2, b2, w3, b3 = prepare_inference_params(params)

    # Tile the batch. Aim for >= 2 grid steps (both v7x TensorCores get work)
    # while keeping the tile large (amortize per-step overhead on v5e/v6e).
    TB = max(8, min(tile_b, _round_up(_cdiv(B, 2), 8)))
    grid = _cdiv(B, TB)
    B_pad = grid * TB
    if B_pad != B:
        x = jnp.pad(x, ((0, B_pad - B), (0, 0)))

    full2d = lambda i: (0, 0)   # weights/biases: single VMEM-resident block
    single = pl.Buffered(1)     # constant index_map -> no double-buffering

    flops = 2 * B_pad * (1024 * 512 + 512 * 256 + 256 * _N3_MM_PAD)
    bytes_accessed = (
        B_pad * 1024 * x.dtype.itemsize                       # x read
        + sum(int(a.size) * a.dtype.itemsize
              for a in (w1, b1, w2, b2, w3, b3))               # weights read
        + B_pad * _N_OUT_PAD * 4)                              # out write
    transcendentals = B_pad * _N_OUT_PAD                       # tanh

    out = pl.pallas_call(
        transformation_kernel,
        out_shape=jax.ShapeDtypeStruct((B_pad, _N_OUT_PAD), jnp.float32),
        grid_spec=pltpu.PrefetchScalarGridSpec(
            num_scalar_prefetch=0,
            grid=(grid,),
            in_specs=[
                pl.BlockSpec((TB, 1024), lambda i: (i, 0)),          # x tile
                pl.BlockSpec((1024, 512), full2d, pipeline_mode=single),   # w1
                pl.BlockSpec((1, 512), full2d, pipeline_mode=single),      # b1
                pl.BlockSpec((512, 256), full2d, pipeline_mode=single),    # w2
                pl.BlockSpec((1, 256), full2d, pipeline_mode=single),      # b2
                pl.BlockSpec((256, _N3_MM_PAD), full2d, pipeline_mode=single),  # w3
                pl.BlockSpec((1, _N3_MM_PAD), full2d, pipeline_mode=single),    # b3
            ],
            out_specs=pl.BlockSpec((TB, _N_OUT_PAD), lambda i: (i, 0)),
        ),
        compiler_params=pltpu.CompilerParams(
            dimension_semantics=("parallel",),
            vmem_limit_bytes=48 * 1024 * 1024),
        cost_estimate=pl.CostEstimate(
            flops=flops,
            transcendentals=transcendentals,
            bytes_accessed=bytes_accessed),
    )(x, w1, b1, w2, b2, w3, b3)

    return out[:B, :9]


# ---------------------------------------------------------------------------
# Parameter init (mimics fresh PyTorch Linear + BatchNorm1d state)
# ---------------------------------------------------------------------------
def init_params(key):
    dims = [(1024, 512), (512, 256), (256, 9)]
    params = []
    for i, (fin, fout) in enumerate(dims):
        kw, kb = jax.random.split(jax.random.fold_in(key, i))
        bound = 1.0 / jnp.sqrt(jnp.float32(fin))
        w = jax.random.uniform(kw, (fin, fout), jnp.float32, -bound, bound)  # (in, out)
        b = jax.random.uniform(kb, (1, fout), jnp.float32, -bound, bound)
        gamma = jnp.ones((1, fout), jnp.float32)   # BN weight
        beta = jnp.zeros((1, fout), jnp.float32)   # BN bias
        rmean = jnp.zeros((1, fout), jnp.float32)  # BN running_mean
        rvar = jnp.ones((1, fout), jnp.float32)    # BN running_var
        params += [w, b, gamma, beta, rmean, rvar]
    return tuple(params)


# ---------------------------------------------------------------------------
# References for correctness checks
# ---------------------------------------------------------------------------
def reference_forward_f32(x, params):
    """Pure-JAX f32 reference (exact eval-mode math)."""
    h = x
    for i in range(3):
        w, b, g, bt, m, v = params[6 * i: 6 * i + 6]
        h = h @ w + b
        h = g * (h - m) * jax.lax.rsqrt(v + _EPS) + bt
        if i < 2:
            h = jnp.maximum(h, 0.0)
    return jnp.tanh(h)


def reference_forward_bf16(x, params):
    """Pure-JAX reference using the same BN-fold + bf16 matmul operands."""
    w1, b1, w2, b2, w3, b3 = prepare_inference_params(params)
    h = jnp.dot(x.astype(jnp.bfloat16), w1, preferred_element_type=jnp.float32) + b1
    h = jnp.maximum(h, 0.0)
    h = jnp.dot(h.astype(jnp.bfloat16), w2, preferred_element_type=jnp.float32) + b2
    h = jnp.maximum(h, 0.0)
    h = jnp.dot(h.astype(jnp.bfloat16), w3, preferred_element_type=jnp.float32) + b3
    return jnp.tanh(h)[:, :9]


if __name__ == "__main__":
    key = jax.random.PRNGKey(0)
    kx, kp = jax.random.split(key)

    params = init_params(kp)

    # Primary small test (single grid step)
    B = 8
    x = jax.random.normal(kx, (B, 1024), dtype=jnp.float32)
    out = jax.block_until_ready(transformation_forward(x, params))
    assert out.shape == (B, 9)
    assert jnp.allclose(out, reference_forward_bf16(x, params), atol=2e-3, rtol=2e-3), \
        "mismatch vs bf16-matched reference"
    assert jnp.allclose(out, reference_forward_f32(x, params), atol=5e-2, rtol=5e-2), \
        "mismatch vs f32 reference"

    # Ragged-batch test (exercises host-side padding of the batch tile)
    B2 = 5
    x2 = jax.random.normal(jax.random.fold_in(kx, 1), (B2, 1024), dtype=jnp.float32)
    out2 = jax.block_until_ready(transformation_forward(x2, params))
    assert out2.shape == (B2, 9)
    assert jnp.allclose(out2, reference_forward_bf16(x2, params), atol=2e-3, rtol=2e-3)

    # Multi-grid-step test (B=24 -> TB=16, grid=2, padded to 32 rows)
    B3 = 24
    x3 = jax.random.normal(jax.random.fold_in(kx, 2), (B3, 1024), dtype=jnp.float32)
    out3 = jax.block_until_ready(transformation_forward(x3, params))
    assert out3.shape == (B3, 9)
    assert jnp.allclose(out3, reference_forward_bf16(x3, params), atol=2e-3, rtol=2e-3)

    # bf16-input path (no wrapper-side cast; kernel skips the astype)
    x_bf16 = x.astype(jnp.bfloat16)
    out_bf = jax.block_until_ready(transformation_forward(x_bf16, params))
    assert out_bf.shape == (B, 9)
    assert jnp.allclose(out_bf,
                        reference_forward_bf16(x_bf16.astype(jnp.float32), params),
                        atol=2e-3, rtol=2e-3)

    print("KERNEL_OK")
</pallas_src>

<mosaic_0001>
module attributes {stable_mosaic.version = 11 : i64} {
  func.func @transformation_kernel(%arg0: i32, %arg1: memref<8x1024xf32, #tpu.memory_space<vmem>>, %arg2: memref<1024x512xbf16, #tpu.memory_space<vmem>>, %arg3: memref<1x512xf32, #tpu.memory_space<vmem>>, %arg4: memref<512x256xbf16, #tpu.memory_space<vmem>>, %arg5: memref<1x256xf32, #tpu.memory_space<vmem>>, %arg6: memref<256x128xbf16, #tpu.memory_space<vmem>>, %arg7: memref<1x128xf32, #tpu.memory_space<vmem>>, %arg8: memref<8x16xf32, #tpu.memory_space<vmem>>) attributes {dimension_semantics = [#tpu.dimension_semantics<parallel>], iteration_bounds = array<i64: 1>, scalar_prefetch = 0 : i64, scratch_operands = 0 : i64, tpu.core_type = #tpu.core_type<tc>, window_params = [{transform_indices = @transform_0, window_bounds = array<i64: 8, 1024>}, {pipeline_mode = #tpu.pipeline_mode<synchronous>, transform_indices = @transform_1, window_bounds = array<i64: 1024, 512>}, {pipeline_mode = #tpu.pipeline_mode<synchronous>, transform_indices = @transform_2, window_bounds = array<i64: 1, 512>}, {pipeline_mode = #tpu.pipeline_mode<synchronous>, transform_indices = @transform_3, window_bounds = array<i64: 512, 256>}, {pipeline_mode = #tpu.pipeline_mode<synchronous>, transform_indices = @transform_4, window_bounds = array<i64: 1, 256>}, {pipeline_mode = #tpu.pipeline_mode<synchronous>, transform_indices = @transform_5, window_bounds = array<i64: 256, 128>}, {pipeline_mode = #tpu.pipeline_mode<synchronous>, transform_indices = @transform_6, window_bounds = array<i64: 1, 128>}, {transform_indices = @transform_7, window_bounds = array<i64: 8, 16>}]} {
    %c0 = arith.constant 0 : index
    %c0_0 = arith.constant 0 : index
    %0 = vector.load %arg1[%c0, %c0_0] : memref<8x1024xf32, #tpu.memory_space<vmem>>, vector<8x1024xf32>
    %1 = arith.truncf %0 : vector<8x1024xf32> to vector<8x1024xbf16>
    %c0_1 = arith.constant 0 : index
    %c0_2 = arith.constant 0 : index
    %2 = vector.load %arg2[%c0_1, %c0_2] : memref<1024x512xbf16, #tpu.memory_space<vmem>>, vector<1024x512xbf16>
    %cst = arith.constant dense<0.000000e+00> : vector<8x512xf32>
    %3 = tpu.matmul %1, %2, %cst {dimension_numbers = #tpu.dot_dimension_numbers<[1], [0], [0], [1], [0, 0, 1, 1], [], []>} : vector<8x1024xbf16>, vector<1024x512xbf16>, vector<8x512xf32> -> vector<8x512xf32>
    %c0_3 = arith.constant 0 : index
    %c0_4 = arith.constant 0 : index
    %4 = vector.load %arg3[%c0_3, %c0_4] : memref<1x512xf32, #tpu.memory_space<vmem>>, vector<1x512xf32>
    %5 = vector.broadcast %4 : vector<1x512xf32> to vector<8x512xf32>
    %6 = arith.addf %3, %5 : vector<8x512xf32>
    %cst_5 = arith.constant 0.000000e+00 : f32
    %7 = vector.broadcast %cst_5 : f32 to vector<8x512xf32>
    %8 = arith.maximumf %6, %7 : vector<8x512xf32>
    %9 = arith.truncf %8 : vector<8x512xf32> to vector<8x512xbf16>
    %c0_6 = arith.constant 0 : index
    %c0_7 = arith.constant 0 : index
    %10 = vector.load %arg4[%c0_6, %c0_7] : memref<512x256xbf16, #tpu.memory_space<vmem>>, vector<512x256xbf16>
    %cst_8 = arith.constant dense<0.000000e+00> : vector<8x256xf32>
    %11 = tpu.matmul %9, %10, %cst_8 {dimension_numbers = #tpu.dot_dimension_numbers<[1], [0], [0], [1], [0, 0, 1, 1], [], []>} : vector<8x512xbf16>, vector<512x256xbf16>, vector<8x256xf32> -> vector<8x256xf32>
    %c0_9 = arith.constant 0 : index
    %c0_10 = arith.constant 0 : index
    %12 = vector.load %arg5[%c0_9, %c0_10] : memref<1x256xf32, #tpu.memory_space<vmem>>, vector<1x256xf32>
    %13 = vector.broadcast %12 : vector<1x256xf32> to vector<8x256xf32>
    %14 = arith.addf %11, %13 : vector<8x256xf32>
    %cst_11 = arith.constant 0.000000e+00 : f32
    %15 = vector.broadcast %cst_11 : f32 to vector<8x256xf32>
    %16 = arith.maximumf %14, %15 : vector<8x256xf32>
    %17 = arith.truncf %16 : vector<8x256xf32> to vector<8x256xbf16>
    %c0_12 = arith.constant 0 : index
    %c0_13 = arith.constant 0 : index
    %18 = vector.load %arg6[%c0_12, %c0_13] : memref<256x128xbf16, #tpu.memory_space<vmem>>, vector<256x128xbf16>
    %cst_14 = arith.constant dense<0.000000e+00> : vector<8x128xf32>
    %19 = tpu.matmul %17, %18, %cst_14 {dimension_numbers = #tpu.dot_dimension_numbers<[1], [0], [0], [1], [0, 0, 1, 1], [], []>} : vector<8x256xbf16>, vector<256x128xbf16>, vector<8x128xf32> -> vector<8x128xf32>
    %c0_15 = arith.constant 0 : index
    %c0_16 = arith.constant 0 : index
    %20 = vector.load %arg7[%c0_15, %c0_16] : memref<1x128xf32, #tpu.memory_space<vmem>>, vector<1x128xf32>
    %21 = vector.broadcast %20 : vector<1x128xf32> to vector<8x128xf32>
    %22 = arith.addf %19, %21 : vector<8x128xf32>
    %23 = vector.extract_strided_slice %22 {offsets = [0, 0], sizes = [8, 16], strides = [1, 1]} : vector<8x128xf32> to vector<8x16xf32>
    %24 = math.tanh %23 : vector<8x16xf32>
    %c0_17 = arith.constant 0 : index
    %c0_18 = arith.constant 0 : index
    %25 = vector.load %arg8[%c0_17, %c0_18] : memref<8x16xf32, #tpu.memory_space<vmem>>, vector<8x16xf32>
    tpu.vector_store %arg8[%c0_17, %c0_18], %24 {strides = array<i32>} : memref<8x16xf32, #tpu.memory_space<vmem>>, vector<8x16xf32>,
    return
  }
  func.func @transform_0(%arg0: i32) -> (i32, i32) {
    %c0_i32 = arith.constant 0 : i32
    %c0_i32_0 = arith.constant 0 : i32
    return %arg0, %c0_i32 : i32, i32
  }
  func.func @transform_1(%arg0: i32) -> (i32, i32) {
    %c0_i32 = arith.constant 0 : i32
    %c0_i32_0 = arith.constant 0 : i32
    %c0_i32_1 = arith.constant 0 : i32
    return %c0_i32, %c0_i32_0 : i32, i32
  }
  func.func @transform_2(%arg0: i32) -> (i32, i32) {
    %c0_i32 = arith.constant 0 : i32
    %c0_i32_0 = arith.constant 0 : i32
    %c0_i32_1 = arith.constant 0 : i32
    return %c0_i32, %c0_i32_0 : i32, i32
  }
  func.func @transform_3(%arg0: i32) -> (i32, i32) {
    %c0_i32 = arith.constant 0 : i32
    %c0_i32_0 = arith.constant 0 : i32
    %c0_i32_1 = arith.constant 0 : i32
    return %c0_i32, %c0_i32_0 : i32, i32
  }
  func.func @transform_4(%arg0: i32) -> (i32, i32) {
    %c0_i32 = arith.constant 0 : i32
    %c0_i32_0 = arith.constant 0 : i32
    %c0_i32_1 = arith.constant 0 : i32
    return %c0_i32, %c0_i32_0 : i32, i32
  }
  func.func @transform_5(%arg0: i32) -> (i32, i32) {
    %c0_i32 = arith.constant 0 : i32
    %c0_i32_0 = arith.constant 0 : i32
    %c0_i32_1 = arith.constant 0 : i32
    return %c0_i32, %c0_i32_0 : i32, i32
  }
  func.func @transform_6(%arg0: i32) -> (i32, i32) {
    %c0_i32 = arith.constant 0 : i32
    %c0_i32_0 = arith.constant 0 : i32
    %c0_i32_1 = arith.constant 0 : i32
    return %c0_i32, %c0_i32_0 : i32, i32
  }
  func.func @transform_7(%arg0: i32) -> (i32, i32) {
    %c0_i32 = arith.constant 0 : i32
    %c0_i32_0 = arith.constant 0 : i32
    return %arg0, %c0_i32 : i32, i32
  }
}

</mosaic_0001>

<bundles_post_ra>
// kernel: tpu_custom_call.1
= control target key start
LH: loop header
LB: loop body
LE: loop exit
PB: predicated region body
PF: predicated region fallthrough
CT: control target
= control target key end

     0   :  { %12 = vsyncpa [#allocation3], 0  ;;  %s3816_s0 = inlined_call_operand.hbm [shape: f32[8,1024], index: 0, kind: input, shape index: {}]   ;;  %s3817_s1 = inlined_call_operand.hbm [shape: bf16[1024,512], index: 1, kind: input, shape index: {}]   ;;  %s3818_s2 = inlined_call_operand.hbm [shape: f32[1,512], index: 2, kind: input, shape index: {}]   ;;  %s3819_s3 = inlined_call_operand.hbm [shape: bf16[512,256], index: 3, kind: input, shape index: {}]   ;;  %s3820_s4 = inlined_call_operand.vmem [shape: f32[1,256], index: 4, kind: input, shape index: {}]   ;;  %s3821_s5 = inlined_call_operand.hbm [shape: bf16[256,128], index: 5, kind: input, shape index: {}]   ;;  %s3822_s6 = inlined_call_operand.vmem [shape: f32[1,128], index: 6, kind: input, shape index: {}]   ;;  %s3823_s7 = inlined_call_operand.hbm [shape: f32[8,16], index: 7, kind: output, shape index: {}]  }
   0x1   :  { %13 = vsyncpa [#allocation6], 0 }
   0x2   :  { %14 = vsyncpa [#allocation9], 0 }
   0x3   :  { %15 = vsyncpa [#allocation4], 0  ;;  %s3676_s24 = smov [#allocation5]  }
   0x4   :  { %s31_s25 = sshll.u32 %s3676_s24, 4  ;;  %s32_s25 = int_to_ptr.vmem [resolvable:$true] %s31_s25 }
   0x5   :  { %s3556_s26 = scalar_lea.vmem %s32_s25, 32768  ;;  %p3561_p1 = scmp.lt.s32.totalorder %s32_s25, %s32_s25 }
   0x6   :  { %p3557_p0 = scmp.ne.s32.totalorder %s32_s25, %s3556_s26  ;;  %p3562_p2 = scmp.lt.s32.totalorder %s3556_s26, %s3556_s26 }
   0x8   :  { %p3563_p3 = por %p3562_p2, %p3561_p1 }
   0xa   :  { %p3564_p4 = pnand %p3563_p3, %p3557_p0 }
   0xc   :  { %3567 = shalt.err (!%p3564_p4)
}
   0xd   :  { %s3677_s27 = smov 256   ;;  %s3678_s28 = smov 16  }
   0xe   :  { %37 = dma.hbm_to_vmem [thread:$0]  %s3817_s1, 32768, %s32_s25, [#allocation6], %s3677_s27, %s3677_s27, %s3678_s28  }
   0xf   :  { %s3679_s8 = smov [#allocation8]  }
  0x10   :  { %s53_s9 = sshll.u32 %s3679_s8, 4  ;;  %s54_s9 = int_to_ptr.vmem [resolvable:$true] %s53_s9 }
  0x11   :  { %s3576_s10 = scalar_lea.vmem %s54_s9, 8192  ;;  %p3581_p6 = scmp.lt.s32.totalorder %s54_s9, %s54_s9 }
  0x12   :  { %p3577_p5 = scmp.ne.s32.totalorder %s54_s9, %s3576_s10  ;;  %p3582_p7 = scmp.lt.s32.totalorder %s3576_s10, %s3576_s10 }
  0x14   :  { %p3583_p8 = por %p3582_p7, %p3581_p6 }
  0x16   :  { %p3584_p9 = pnand %p3583_p8, %p3577_p5 }
  0x18   :  { %3587 = shalt.err (!%p3584_p9)
}
  0x19   :  { %s3680_s11 = smov 128   ;;  %s3681_s12 = smov 8  }
  0x1a   :  { %59 = dma.hbm_to_vmem [thread:$0]  %s3819_s3, 8192, %s54_s9, [#allocation9], %s3680_s11, %s3680_s11, %s3681_s12  }
  0x1b   :  { %s3682_s15 = smov [#allocation2]   ;;  %s3683_s17 = smov [#allocation7]  }
  0x1c   :  { %s22_s16 = sshll.u32 %s3682_s15, 4  ;;  %s44_s1 = sshll.u32 %s3683_s17, 4  ;;  %s23_s16 = int_to_ptr.vmem [resolvable:$true] %s22_s16  ;;  %s45_s1 = int_to_ptr.vmem [resolvable:$true] %s44_s1 }
  0x1d   :  { %s3596_s18 = scalar_lea.vmem %s23_s16, 1024  ;;  %p3601_p11 = scmp.lt.s32.totalorder %s23_s16, %s23_s16 }
  0x1e   :  { %p3597_p10 = scmp.ne.s32.totalorder %s23_s16, %s3596_s18  ;;  %p3602_p12 = scmp.lt.s32.totalorder %s3596_s18, %s3596_s18 }
  0x20   :  { %p3603_p13 = por %p3602_p12, %p3601_p11 }
  0x22   :  { %p3604_p0 = pnand %p3603_p13, %p3597_p10 }
  0x24   :  { %3607 = shalt.err (!%p3604_p0)
}
  0x25   :  { %25 = dma.hbm_to_vmem [thread:$0]  %s3816_s0, 1024, %s23_s16, [#allocation3]  }
  0x26   :  { %s3616_s21 = scalar_lea.vmem %s45_s1, 64  ;;  %p3621_p2 = scmp.lt.s32.totalorder %s45_s1, %s45_s1 }
  0x27   :  { %p3617_p1 = scmp.ne.s32.totalorder %s45_s1, %s3616_s21  ;;  %p3622_p3 = scmp.lt.s32.totalorder %s3616_s21, %s3616_s21 }
  0x29   :  { %p3623_p4 = por %p3622_p3, %p3621_p2 }
  0x2b   :  { %p3624_p5 = pnand %p3623_p4, %p3617_p1 }
  0x2d   :  { %3627 = shalt.err (!%p3624_p5)
}
  0x2e   :  { %47 = dma.hbm_to_vmem [thread:$0]  %s3818_s2, 64, %s45_s1, [#allocation6]  }
  0x2f   :  { %s3684_s23 = smov [#allocation10]  }
  0x30   :  { %s67_s24 = sshll.u32 %s3684_s23, 4  ;;  %s68_s24 = int_to_ptr.vmem [resolvable:$true] %s67_s24 }
  0x31   :  { %s3636_s25 = scalar_lea.vmem %s68_s24, 2048  ;;  %p3641_p7 = scmp.lt.s32.totalorder %s68_s24, %s68_s24 }
  0x32   :  { %p3637_p6 = scmp.ne.s32.totalorder %s68_s24, %s3636_s25  ;;  %p3642_p8 = scmp.lt.s32.totalorder %s3636_s25, %s3636_s25 }
  0x34   :  { %p3643_p9 = por %p3642_p8, %p3641_p7 }
  0x36   :  { %p3644_p10 = pnand %p3643_p9, %p3637_p6 }
  0x38   :  { %3647 = shalt.err (!%p3644_p10)
}
  0x39   :  { %s3685_s0 = smov 64   ;;  %s3686_s26 = smov 4  }
  0x3a   :  { %73 = dma.hbm_to_vmem [thread:$0]  %s3821_s5, 2048, %s68_s24, [#allocation9], %s3685_s0, %s3685_s0, %s3686_s26  }
  0x3b   :  { %3668 = dma.done.wait [#allocation3], 1024  }
  0x3c   :  { %3669 = vsyncadd [#allocation3], 4294966272 }
  0x3d   :  { %3670 = dma.done.wait [#allocation6], 32832  }
  0x3e   :  { %3671 = vsyncadd [#allocation6], 4294934464 }
  0x3f   :  { %3672 = dma.done.wait [#allocation9], 10240  }
  0x40   :  { %3673 = vsyncadd [#allocation9], 4294957056  ;;  %v3050_v0 = vld [vmem:[#allocation5 + $0xe4] ss:$16 sps:$4 sm:$0xff]   ;;  %v3054_v2 = vld [vmem:[#allocation5 + $0xe0] ss:$16 sps:$4 sm:$0xff]  }
  0x41   :  { %v3052_v1 = vld [vmem:[#allocation5 + $0x2e4] ss:$16 sps:$4 sm:$0xff]   ;;  %1666 = vmatprep.subr.bf16.mxu0 %v3050_v0  ;;  %v3055_v3 = vld [vmem:[#allocation5 + $0x2e0] ss:$16 sps:$4 sm:$0xff]   ;;  %v93_v46 = vld [vmem:[#allocation2 + $0x8] sm:$0xff]  ;;  %s3687_s30 = smov [#allocation11]  }
  0x42   :  { %1707 = vmatprep.subr.bf16.mxu1 %v3052_v1  ;;  %v3056_v4 = vld [vmem:[#allocation5 + $0xc4] ss:$16 sps:$4 sm:$0xff]   ;;  %1667 = vmatpush1.bf16.msra.mxu0 %v3054_v2  ;;  %v3060_v6 = vld [vmem:[#allocation5 + $0xc0] ss:$16 sps:$4 sm:$0xff]   ;;  %v3743_v49 = vpack.c.bf16 %v93_v46, %v93_v46  ;;  %v95_v50 = vld [vmem:[#allocation2 + $0x18] sm:$0xff]  ;;  %s2668_s8 = sshll.u32 %s3687_s30, 4  ;;  %s2669_s8 = int_to_ptr.vmem [resolvable:$true] %s2668_s8 }
  0x43   :  { %1708 = vmatpush1.bf16.msra.mxu1 %v3055_v3  ;;  %v3058_v5 = vld [vmem:[#allocation5 + $0x2c4] ss:$16 sps:$4 sm:$0xff]   ;;  %1668 = vmatprep.subr.bf16.mxu0 %v3056_v4  ;;  %v3061_v7 = vld [vmem:[#allocation5 + $0x2c0] ss:$16 sps:$4 sm:$0xff]   ;;  %v3745_v52 = vpack.c.bf16 %v95_v50, %v95_v50  ;;  %vm2660_vm0 = vcmask 130048   ;;  %s3648_s9 = scalar_lea.vmem %s2669_s8, 128  ;;  %p3653_p12 = scmp.lt.s32.totalorder %s2669_s8, %s2669_s8 }
  0x44   :  { %1709 = vmatprep.subr.bf16.mxu1 %v3058_v5  ;;  %v3062_v8 = vld [vmem:[#allocation5 + $0xa4] ss:$16 sps:$4 sm:$0xff]   ;;  %v3066_v10 = vld [vmem:[#allocation5 + $0xa0] ss:$16 sps:$4 sm:$0xff]   ;;  %1698 = vmatprep.mubr.bf16.mxu0 %v3743_v49  ;;  %p3649_p11 = scmp.ne.s32.totalorder %s2669_s8, %s3648_s9  ;;  %p3654_p13 = scmp.lt.s32.totalorder %s3648_s9, %s3648_s9 }
  0x45   :  { %v3064_v9 = vld [vmem:[#allocation5 + $0x2a4] ss:$16 sps:$4 sm:$0xff]   ;;  %v3067_v11 = vld [vmem:[#allocation5 + $0x2a0] ss:$16 sps:$4 sm:$0xff]   ;;  %1739 = vmatprep.mubr.bf16.mxu1 %v3745_v52 }
  0x46   :  { %1669 = vmatpush1.bf16.msra.mxu0 %v3060_v6  ;;  %v3068_v12 = vld [vmem:[#allocation5 + $0x84] ss:$16 sps:$4 sm:$0xff]   ;;  %v3072_v14 = vld [vmem:[#allocation5 + $0x80] ss:$16 sps:$4 sm:$0xff]   ;;  %p3655_p0 = por %p3654_p13, %p3653_p12 }
  0x47   :  { %1710 = vmatpush1.bf16.msra.mxu1 %v3061_v7  ;;  %1670 = vmatprep.subr.bf16.mxu0 %v3062_v8  ;;  %v3070_v13 = vld [vmem:[#allocation5 + $0x284] ss:$16 sps:$4 sm:$0xff]   ;;  %v3073_v15 = vld [vmem:[#allocation5 + $0x280] ss:$16 sps:$4 sm:$0xff]  }
  0x48   :  { %1711 = vmatprep.subr.bf16.mxu1 %v3064_v9  ;;  %v3074_v16 = vld [vmem:[#allocation5 + $0x64] ss:$16 sps:$4 sm:$0xff]   ;;  %v3078_v18 = vld [vmem:[#allocation5 + $0x60] ss:$16 sps:$4 sm:$0xff]   ;;  %p3656_p1 = pnand %p3655_p0, %p3649_p11 }
  0x49   :  { %v3076_v17 = vld [vmem:[#allocation5 + $0x264] ss:$16 sps:$4 sm:$0xff]   ;;  %v3079_v19 = vld [vmem:[#allocation5 + $0x260] ss:$16 sps:$4 sm:$0xff]  }
  0x4a   :  { %1671 = vmatpush1.bf16.msra.mxu0 %v3066_v10  ;;  %v3080_v20 = vld [vmem:[#allocation5 + $0x44] ss:$16 sps:$4 sm:$0xff]   ;;  %v3084_v22 = vld [vmem:[#allocation5 + $0x40] ss:$16 sps:$4 sm:$0xff]  }
  0x4b   :  { %1712 = vmatpush1.bf16.msra.mxu1 %v3067_v11  ;;  %1672 = vmatprep.subr.bf16.mxu0 %v3068_v12  ;;  %v3082_v21 = vld [vmem:[#allocation5 + $0x244] ss:$16 sps:$4 sm:$0xff]   ;;  %v3085_v23 = vld [vmem:[#allocation5 + $0x240] ss:$16 sps:$4 sm:$0xff]  }
  0x4c   :  { %1713 = vmatprep.subr.bf16.mxu1 %v3070_v13  ;;  %v3086_v24 = vld [vmem:[#allocation5 + $0x24] ss:$16 sps:$4 sm:$0xff]   ;;  %v3090_v26 = vld [vmem:[#allocation5 + $0x20] ss:$16 sps:$4 sm:$0xff]  }
  0x4d   :  { %v3088_v25 = vld [vmem:[#allocation5 + $0x224] ss:$16 sps:$4 sm:$0xff]   ;;  %v3091_v27 = vld [vmem:[#allocation5 + $0x220] ss:$16 sps:$4 sm:$0xff]  }
  0x4e   :  { %1673 = vmatpush1.bf16.msra.mxu0 %v3072_v14  ;;  %v3092_v28 = vld [vmem:[#allocation5 + $0x4] ss:$16 sps:$4 sm:$0xff]   ;;  %v3096_v30 = vld [vmem:[#allocation5] ss:$16 sps:$4 sm:$0xff]  }
  0x4f   :  { %1714 = vmatpush1.bf16.msra.mxu1 %v3073_v15  ;;  %1674 = vmatprep.subr.bf16.mxu0 %v3074_v16  ;;  %v3094_v29 = vld [vmem:[#allocation5 + $0x204] ss:$16 sps:$4 sm:$0xff]   ;;  %v3097_v31 = vld [vmem:[#allocation5 + $0x200] ss:$16 sps:$4 sm:$0xff]  }
  0x50   :  { %1715 = vmatprep.subr.bf16.mxu1 %v3076_v17  ;;  %v3098_v32 = vld [vmem:[#allocation5 + $0x1e4] ss:$16 sps:$4 sm:$0xff]   ;;  %v3102_v34 = vld [vmem:[#allocation5 + $0x1e0] ss:$16 sps:$4 sm:$0xff]  }
  0x51   :  { %v3100_v33 = vld [vmem:[#allocation5 + $0x3e4] ss:$16 sps:$4 sm:$0xff]   ;;  %v3103_v35 = vld [vmem:[#allocation5 + $0x3e0] ss:$16 sps:$4 sm:$0xff]  }
  0x52   :  { %1675 = vmatpush1.bf16.msra.mxu0 %v3078_v18  ;;  %v3104_v36 = vld [vmem:[#allocation5 + $0x1c4] ss:$16 sps:$4 sm:$0xff]   ;;  %v3108_v38 = vld [vmem:[#allocation5 + $0x1c0] ss:$16 sps:$4 sm:$0xff]  }
  0x53   :  { %1716 = vmatpush1.bf16.msra.mxu1 %v3079_v19  ;;  %1676 = vmatprep.subr.bf16.mxu0 %v3080_v20  ;;  %v3106_v37 = vld [vmem:[#allocation5 + $0x3c4] ss:$16 sps:$4 sm:$0xff]   ;;  %v3109_v39 = vld [vmem:[#allocation5 + $0x3c0] ss:$16 sps:$4 sm:$0xff]  }
  0x54   :  { %1717 = vmatprep.subr.bf16.mxu1 %v3082_v21  ;;  %v3110_v40 = vld [vmem:[#allocation5 + $0x1a4] ss:$16 sps:$4 sm:$0xff]   ;;  %v3114_v42 = vld [vmem:[#allocation5 + $0x1a0] ss:$16 sps:$4 sm:$0xff]  }
  0x55   :  { %v3112_v41 = vld [vmem:[#allocation5 + $0x3a4] ss:$16 sps:$4 sm:$0xff]   ;;  %v3115_v43 = vld [vmem:[#allocation5 + $0x3a0] ss:$16 sps:$4 sm:$0xff]  }
  0x56   :  { %1677 = vmatpush1.bf16.msra.mxu0 %v3084_v22  ;;  %v3116_v44 = vld [vmem:[#allocation5 + $0x184] ss:$16 sps:$4 sm:$0xff]   ;;  %v3120_v47 = vld [vmem:[#allocation5 + $0x180] ss:$16 sps:$4 sm:$0xff]  }
  0x57   :  { %1718 = vmatpush1.bf16.msra.mxu1 %v3085_v23  ;;  %1678 = vmatprep.subr.bf16.mxu0 %v3086_v24  ;;  %v3118_v45 = vld [vmem:[#allocation5 + $0x384] ss:$16 sps:$4 sm:$0xff]   ;;  %v3121_v48 = vld [vmem:[#allocation5 + $0x380] ss:$16 sps:$4 sm:$0xff]  }
  0x58   :  { %1719 = vmatprep.subr.bf16.mxu1 %v3088_v25  ;;  %v3122_v51 = vld [vmem:[#allocation5 + $0x164] ss:$16 sps:$4 sm:$0xff]   ;;  %v3126_v54 = vld [vmem:[#allocation5 + $0x160] ss:$16 sps:$4 sm:$0xff]  }
  0x59   :  { %v3124_v53 = vld [vmem:[#allocation5 + $0x364] ss:$16 sps:$4 sm:$0xff]   ;;  %v3127_v55 = vld [vmem:[#allocation5 + $0x360] ss:$16 sps:$4 sm:$0xff]  }
  0x5a   :  { %1679 = vmatpush1.bf16.msra.mxu0 %v3090_v26  ;;  %v3128_v56 = vld [vmem:[#allocation5 + $0x144] ss:$16 sps:$4 sm:$0xff]   ;;  %v3132_v58 = vld [vmem:[#allocation5 + $0x140] ss:$16 sps:$4 sm:$0xff]  }
  0x5b   :  { %1720 = vmatpush1.bf16.msra.mxu1 %v3091_v27  ;;  %1680 = vmatprep.subr.bf16.mxu0 %v3092_v28  ;;  %v3130_v57 = vld [vmem:[#allocation5 + $0x344] ss:$16 sps:$4 sm:$0xff]   ;;  %v3133_v59 = vld [vmem:[#allocation5 + $0x340] ss:$16 sps:$4 sm:$0xff]  }
  0x5c   :  { %1721 = vmatprep.subr.bf16.mxu1 %v3094_v29  ;;  %v3134_v60 = vld [vmem:[#allocation5 + $0x124] ss:$16 sps:$4 sm:$0xff]   ;;  %v3138_v62 = vld [vmem:[#allocation5 + $0x120] ss:$16 sps:$4 sm:$0xff]  }
  0x5d   :  { %v3136_v61 = vld [vmem:[#allocation5 + $0x324] ss:$16 sps:$4 sm:$0xff]   ;;  %v3139_v63 = vld [vmem:[#allocation5 + $0x320] ss:$16 sps:$4 sm:$0xff]  }
  0x5e   :  { %1681 = vmatpush1.bf16.msra.mxu0 %v3096_v30  ;;  %v3140_v0 = vld [vmem:[#allocation5 + $0x104] ss:$16 sps:$4 sm:$0xff]   ;;  %v3144_v2 = vld [vmem:[#allocation5 + $0x100] ss:$16 sps:$4 sm:$0xff]  }
  0x5f   :  { %1722 = vmatpush1.bf16.msra.mxu1 %v3097_v31  ;;  %1682 = vmatprep.subr.bf16.mxu0 %v3098_v32  ;;  %v3142_v1 = vld [vmem:[#allocation5 + $0x304] ss:$16 sps:$4 sm:$0xff]   ;;  %v3145_v3 = vld [vmem:[#allocation5 + $0x300] ss:$16 sps:$4 sm:$0xff]  }
  0x60   :  { %1723 = vmatprep.subr.bf16.mxu1 %v3100_v33  ;;  %v92_v4 = vld [vmem:[#allocation2] sm:$0xff]  ;;  %v94_v5 = vld [vmem:[#allocation2 + $0x10] sm:$0xff] }
  0x61   :  { %v3148_v6 = vld [vmem:[#allocation5 + $0x4e4] ss:$16 sps:$4 sm:$0xff]   ;;  %v3749_v8 = vpack.c.bf16 %v92_v4, %v92_v4  ;;  %v3751_v9 = vpack.c.bf16 %v94_v5, %v94_v5  ;;  %v3146_v10 = vld [vmem:[#allocation5 + $0x4e0] ss:$16 sps:$4 sm:$0xff]  }
  0x62   :  { %1683 = vmatpush2.bf16.msra.mxu0 %v3102_v34  ;;  %v3151_v7 = vld [vmem:[#allocation5 + $0x6e4] ss:$16 sps:$4 sm:$0xff]   ;;  %v3149_v11 = vld [vmem:[#allocation5 + $0x6e0] ss:$16 sps:$4 sm:$0xff]   ;;  %v97_v34 = vld [vmem:[#allocation2 + $0x28] sm:$0xff] }
  0x63   :  { %1724 = vmatpush2.bf16.msra.mxu1 %v3103_v35  ;;  %1684 = vmatprep.subr.bf16.mxu0 %v3104_v36  ;;  %v3154_v12 = vld [vmem:[#allocation5 + $0x4c4] ss:$16 sps:$4 sm:$0xff]   ;;  %v3152_v14 = vld [vmem:[#allocation5 + $0x4c0] ss:$16 sps:$4 sm:$0xff]  }
  0x64   :  { %1725 = vmatprep.subr.bf16.mxu1 %v3106_v37  ;;  %v3157_v13 = vld [vmem:[#allocation5 + $0x6c4] ss:$16 sps:$4 sm:$0xff]   ;;  %v3155_v15 = vld [vmem:[#allocation5 + $0x6c0] ss:$16 sps:$4 sm:$0xff]   ;;  %v3755_v37 = vpack.c.bf16 %v97_v34, %v97_v34  ;;  %v3260_v34 = vld [vmem:[#allocation5 + $0x88] ss:$16 sps:$4 sm:$0xff]  }
  0x65   :  { %v3160_v16 = vld [vmem:[#allocation5 + $0x4a4] ss:$16 sps:$4 sm:$0xff]   ;;  %v3158_v18 = vld [vmem:[#allocation5 + $0x4a0] ss:$16 sps:$4 sm:$0xff]  }
  0x66   :  { %1685 = vmatpush2.bf16.msra.mxu0 %v3108_v38  ;;  %v3163_v17 = vld [vmem:[#allocation5 + $0x6a4] ss:$16 sps:$4 sm:$0xff]   ;;  %v3161_v19 = vld [vmem:[#allocation5 + $0x6a0] ss:$16 sps:$4 sm:$0xff]   ;;  %v99_v38 = vld [vmem:[#allocation2 + $0x38] sm:$0xff] }
  0x67   :  { %1726 = vmatpush2.bf16.msra.mxu1 %v3109_v39  ;;  %1686 = vmatprep.subr.bf16.mxu0 %v3110_v40  ;;  %v3166_v20 = vld [vmem:[#allocation5 + $0x484] ss:$16 sps:$4 sm:$0xff]   ;;  %v3164_v22 = vld [vmem:[#allocation5 + $0x480] ss:$16 sps:$4 sm:$0xff]   ;;  %v3757_v40 = vpack.c.bf16 %v99_v38, %v99_v38  ;;  %v3271_v38 = vld [vmem:[#allocation5 + $0x26c] ss:$16 sps:$4 sm:$0xff]  }
  0x68   :  { %1727 = vmatprep.subr.bf16.mxu1 %v3112_v41  ;;  %v3169_v21 = vld [vmem:[#allocation5 + $0x684] ss:$16 sps:$4 sm:$0xff]   ;;  %v3167_v23 = vld [vmem:[#allocation5 + $0x680] ss:$16 sps:$4 sm:$0xff]  }
  0x69   :  { %v3172_v24 = vld [vmem:[#allocation5 + $0x464] ss:$16 sps:$4 sm:$0xff]   ;;  %v3170_v26 = vld [vmem:[#allocation5 + $0x460] ss:$16 sps:$4 sm:$0xff]  }
  0x6a   :  { %1687 = vmatpush2.bf16.msra.mxu0 %v3114_v42  ;;  %v3175_v25 = vld [vmem:[#allocation5 + $0x664] ss:$16 sps:$4 sm:$0xff]   ;;  %v3173_v27 = vld [vmem:[#allocation5 + $0x660] ss:$16 sps:$4 sm:$0xff]  }
  0x6b   :  { %1728 = vmatpush2.bf16.msra.mxu1 %v3115_v43  ;;  %1688 = vmatprep.subr.bf16.mxu0 %v3116_v44  ;;  %v3178_v28 = vld [vmem:[#allocation5 + $0x444] ss:$16 sps:$4 sm:$0xff]   ;;  %v3176_v30 = vld [vmem:[#allocation5 + $0x440] ss:$16 sps:$4 sm:$0xff]  }
  0x6c   :  { %1729 = vmatprep.subr.bf16.mxu1 %v3118_v45  ;;  %v3181_v29 = vld [vmem:[#allocation5 + $0x644] ss:$16 sps:$4 sm:$0xff]   ;;  %v3179_v31 = vld [vmem:[#allocation5 + $0x640] ss:$16 sps:$4 sm:$0xff]  }
  0x6d   :  { %v3184_v32 = vld [vmem:[#allocation5 + $0x424] ss:$16 sps:$4 sm:$0xff]   ;;  %v3182_v35 = vld [vmem:[#allocation5 + $0x420] ss:$16 sps:$4 sm:$0xff]  }
  0x6e   :  { %1689 = vmatpush2.bf16.msra.mxu0 %v3120_v47  ;;  %v3187_v33 = vld [vmem:[#allocation5 + $0x624] ss:$16 sps:$4 sm:$0xff]   ;;  %v3185_v36 = vld [vmem:[#allocation5 + $0x620] ss:$16 sps:$4 sm:$0xff]  }
  0x6f   :  { %1730 = vmatpush2.bf16.msra.mxu1 %v3121_v48  ;;  %1690 = vmatprep.subr.bf16.mxu0 %v3122_v51  ;;  %v3190_v39 = vld [vmem:[#allocation5 + $0x404] ss:$16 sps:$4 sm:$0xff]   ;;  %v3188_v42 = vld [vmem:[#allocation5 + $0x400] ss:$16 sps:$4 sm:$0xff]  }
  0x70   :  { %1731 = vmatprep.subr.bf16.mxu1 %v3124_v53  ;;  %v3193_v41 = vld [vmem:[#allocation5 + $0x604] ss:$16 sps:$4 sm:$0xff]   ;;  %v3191_v43 = vld [vmem:[#allocation5 + $0x600] ss:$16 sps:$4 sm:$0xff]  }
  0x71   :  { %v3196_v44 = vld [vmem:[#allocation5 + $0x5e4] ss:$16 sps:$4 sm:$0xff]   ;;  %v3194_v46 = vld [vmem:[#allocation5 + $0x5e0] ss:$16 sps:$4 sm:$0xff]  }
  0x72   :  { %1691 = vmatpush2.bf16.msra.mxu0 %v3126_v54  ;;  %v3199_v45 = vld [vmem:[#allocation5 + $0x7e4] ss:$16 sps:$4 sm:$0xff]   ;;  %v3197_v47 = vld [vmem:[#allocation5 + $0x7e0] ss:$16 sps:$4 sm:$0xff]  }
  0x73   :  { %1732 = vmatpush2.bf16.msra.mxu1 %v3127_v55  ;;  %1692 = vmatprep.subr.bf16.mxu0 %v3128_v56  ;;  %v3202_v48 = vld [vmem:[#allocation5 + $0x5c4] ss:$16 sps:$4 sm:$0xff]   ;;  %v3200_v51 = vld [vmem:[#allocation5 + $0x5c0] ss:$16 sps:$4 sm:$0xff]  }
  0x74   :  { %1733 = vmatprep.subr.bf16.mxu1 %v3130_v57  ;;  %v3205_v50 = vld [vmem:[#allocation5 + $0x7c4] ss:$16 sps:$4 sm:$0xff]   ;;  %v3203_v53 = vld [vmem:[#allocation5 + $0x7c0] ss:$16 sps:$4 sm:$0xff]  }
  0x75   :  { %v3208_v54 = vld [vmem:[#allocation5 + $0x5a4] ss:$16 sps:$4 sm:$0xff]   ;;  %v3206_v56 = vld [vmem:[#allocation5 + $0x5a0] ss:$16 sps:$4 sm:$0xff]  }
  0x76   :  { %1693 = vmatpush2.bf16.msra.mxu0 %v3132_v58  ;;  %v3211_v55 = vld [vmem:[#allocation5 + $0x7a4] ss:$16 sps:$4 sm:$0xff]   ;;  %v3209_v57 = vld [vmem:[#allocation5 + $0x7a0] ss:$16 sps:$4 sm:$0xff]  }
  0x77   :  { %1734 = vmatpush2.bf16.msra.mxu1 %v3133_v59  ;;  %1694 = vmatprep.subr.bf16.mxu0 %v3134_v60  ;;  %v3214_v58 = vld [vmem:[#allocation5 + $0x584] ss:$16 sps:$4 sm:$0xff]   ;;  %v3212_v60 = vld [vmem:[#allocation5 + $0x580] ss:$16 sps:$4 sm:$0xff]  }
  0x78   :  { %1735 = vmatprep.subr.bf16.mxu1 %v3136_v61  ;;  %v3217_v59 = vld [vmem:[#allocation5 + $0x784] ss:$16 sps:$4 sm:$0xff]   ;;  %v3215_v61 = vld [vmem:[#allocation5 + $0x780] ss:$16 sps:$4 sm:$0xff]  }
  0x79   :  { %v3224_v4 = vld [vmem:[#allocation5 + $0x540] ss:$16 sps:$4 sm:$0xff]  }
  0x7a   :  { %1695 = vmatpush2.bf16.msra.mxu0 %v3138_v62  ;;  %v3220_v62 = vld [vmem:[#allocation5 + $0x564] ss:$16 sps:$4 sm:$0xff]   ;;  %v3227_v5 = vld [vmem:[#allocation5 + $0x740] ss:$16 sps:$4 sm:$0xff]  }
  0x7b   :  { %1736 = vmatpush2.bf16.msra.mxu1 %v3139_v63  ;;  %1696 = vmatprep.subr.bf16.mxu0 %v3140_v0  ;;  %v3223_v63 = vld [vmem:[#allocation5 + $0x764] ss:$16 sps:$4 sm:$0xff]   ;;  %v3218_v0 = vld [vmem:[#allocation5 + $0x560] ss:$16 sps:$4 sm:$0xff]  }
  0x7c   :  { %1737 = vmatprep.subr.bf16.mxu1 %v3142_v1  ;;  %v3221_v1 = vld [vmem:[#allocation5 + $0x760] ss:$16 sps:$4 sm:$0xff]  }
  0x7e   :  { %1697 = vmatpush2.bf16.msra.mxu0 %v3144_v2  ;;  %v3226_v2 = vld [vmem:[#allocation5 + $0x544] ss:$16 sps:$4 sm:$0xff]  }
  0x7f   :  { %1738 = vmatpush2.bf16.msra.mxu1 %v3145_v3  ;;  %1748 = vmatprep.subr.bf16.mxu0 %v3148_v6  ;;  %v3229_v3 = vld [vmem:[#allocation5 + $0x744] ss:$16 sps:$4 sm:$0xff]  }
  0x80   :  { %1789 = vmatprep.subr.bf16.mxu1 %v3151_v7  ;;  %v3232_v6 = vld [vmem:[#allocation5 + $0x524] ss:$16 sps:$4 sm:$0xff]  }
  0x81   :  { %1699 = vmatmul.mubr.bf16.vlgmr.msra.gmra.mxu0 %v3749_v8  ;;  %v3235_v7 = vld [vmem:[#allocation5 + $0x724] ss:$16 sps:$4 sm:$0xff]  }
  0x82   :  { %1740 = vmatmul.mubr.bf16.vlgmr.msra.gmra.mxu1 %v3751_v9  ;;  %1749 = vmatpush1.bf16.msra.mxu0 %v3146_v10  ;;  %v3230_v10 = vld [vmem:[#allocation5 + $0x520] ss:$16 sps:$4 sm:$0xff]  }
  0x83   :  { %1790 = vmatpush1.bf16.msra.mxu1 %v3149_v11  ;;  %1750 = vmatprep.subr.bf16.mxu0 %v3154_v12  ;;  %v3233_v11 = vld [vmem:[#allocation5 + $0x720] ss:$16 sps:$4 sm:$0xff]   ;;  %v3238_v12 = vld [vmem:[#allocation5 + $0x504] ss:$16 sps:$4 sm:$0xff]  }
  0x84   :  { %1791 = vmatprep.subr.bf16.mxu1 %v3157_v13  ;;  %1780 = vmatprep.mubr.bf16.mxu0 %v3755_v37  ;;  %v3241_v13 = vld [vmem:[#allocation5 + $0x704] ss:$16 sps:$4 sm:$0xff]  }
  0x85   :  { %1821 = vmatprep.mubr.bf16.mxu1 %v3757_v40 }
  0x86   :  { %1751 = vmatpush1.bf16.msra.mxu0 %v3152_v14  ;;  %v3236_v14 = vld [vmem:[#allocation5 + $0x500] ss:$16 sps:$4 sm:$0xff]  }
  0x87   :  { %1792 = vmatpush1.bf16.msra.mxu1 %v3155_v15  ;;  %1752 = vmatprep.subr.bf16.mxu0 %v3160_v16  ;;  %v3239_v15 = vld [vmem:[#allocation5 + $0x700] ss:$16 sps:$4 sm:$0xff]  }
  0x88   :  { %1793 = vmatprep.subr.bf16.mxu1 %v3163_v17  ;;  %v96_v16 = vld [vmem:[#allocation2 + $0x20] sm:$0xff]  ;;  %v98_v17 = vld [vmem:[#allocation2 + $0x30] sm:$0xff] }
  0x8a   :  { %1753 = vmatpush1.bf16.msra.mxu0 %v3158_v18  ;;  %v3244_v18 = vld [vmem:[#allocation5 + $0xec] ss:$16 sps:$4 sm:$0xff]  }
  0x8b   :  { %1794 = vmatpush1.bf16.msra.mxu1 %v3161_v19  ;;  %1754 = vmatprep.subr.bf16.mxu0 %v3166_v20  ;;  %v3247_v19 = vld [vmem:[#allocation5 + $0x2ec] ss:$16 sps:$4 sm:$0xff]   ;;  %v3761_v20 = vpack.c.bf16 %v96_v16, %v96_v16 }
  0x8c   :  { %1795 = vmatprep.subr.bf16.mxu1 %v3169_v21  ;;  %v3763_v21 = vpack.c.bf16 %v98_v17, %v98_v17  ;;  %v3328_v16 = vld [vmem:[#allocation5 + $0x12c] ss:$16 sps:$4 sm:$0xff]  }
  0x8d   :  { %v3331_v17 = vld [vmem:[#allocation5 + $0x32c] ss:$16 sps:$4 sm:$0xff]  }
  0x8e   :  { %1755 = vmatpush1.bf16.msra.mxu0 %v3164_v22  ;;  %v3242_v22 = vld [vmem:[#allocation5 + $0xe8] ss:$16 sps:$4 sm:$0xff]  }
  0x8f   :  { %1796 = vmatpush1.bf16.msra.mxu1 %v3167_v23  ;;  %1756 = vmatprep.subr.bf16.mxu0 %v3172_v24  ;;  %v3245_v23 = vld [vmem:[#allocation5 + $0x2e8] ss:$16 sps:$4 sm:$0xff]   ;;  %v3250_v24 = vld [vmem:[#allocation5 + $0xcc] ss:$16 sps:$4 sm:$0xff]  }
  0x90   :  { %1797 = vmatprep.subr.bf16.mxu1 %v3175_v25  ;;  %v3253_v25 = vld [vmem:[#allocation5 + $0x2cc] ss:$16 sps:$4 sm:$0xff]  }
  0x92   :  { %1757 = vmatpush1.bf16.msra.mxu0 %v3170_v26  ;;  %v3248_v26 = vld [vmem:[#allocation5 + $0xc8] ss:$16 sps:$4 sm:$0xff]  }
  0x93   :  { %1798 = vmatpush1.bf16.msra.mxu1 %v3173_v27  ;;  %1758 = vmatprep.subr.bf16.mxu0 %v3178_v28  ;;  %v3251_v27 = vld [vmem:[#allocation5 + $0x2c8] ss:$16 sps:$4 sm:$0xff]   ;;  %v3256_v28 = vld [vmem:[#allocation5 + $0xac] ss:$16 sps:$4 sm:$0xff]  }
  0x94   :  { %1799 = vmatprep.subr.bf16.mxu1 %v3181_v29  ;;  %v3259_v29 = vld [vmem:[#allocation5 + $0x2ac] ss:$16 sps:$4 sm:$0xff]  }
  0x96   :  { %1759 = vmatpush1.bf16.msra.mxu0 %v3176_v30  ;;  %v3254_v30 = vld [vmem:[#allocation5 + $0xa8] ss:$16 sps:$4 sm:$0xff]  }
  0x97   :  { %1800 = vmatpush1.bf16.msra.mxu1 %v3179_v31  ;;  %1760 = vmatprep.subr.bf16.mxu0 %v3184_v32  ;;  %v3257_v31 = vld [vmem:[#allocation5 + $0x2a8] ss:$16 sps:$4 sm:$0xff]   ;;  %v3262_v32 = vld [vmem:[#allocation5 + $0x8c] ss:$16 sps:$4 sm:$0xff]  }
  0x98   :  { %1801 = vmatprep.subr.bf16.mxu1 %v3187_v33  ;;  %v3265_v33 = vld [vmem:[#allocation5 + $0x28c] ss:$16 sps:$4 sm:$0xff]  }
  0x9a   :  { %1761 = vmatpush1.bf16.msra.mxu0 %v3182_v35  ;;  %v3263_v35 = vld [vmem:[#allocation5 + $0x288] ss:$16 sps:$4 sm:$0xff]  }
  0x9b   :  { %1802 = vmatpush1.bf16.msra.mxu1 %v3185_v36  ;;  %1762 = vmatprep.subr.bf16.mxu0 %v3190_v39  ;;  %v3268_v36 = vld [vmem:[#allocation5 + $0x6c] ss:$16 sps:$4 sm:$0xff]   ;;  %v3266_v39 = vld [vmem:[#allocation5 + $0x68] ss:$16 sps:$4 sm:$0xff]  }
  0x9c   :  { %1803 = vmatprep.subr.bf16.mxu1 %v3193_v41  ;;  %v3277_v41 = vld [vmem:[#allocation5 + $0x24c] ss:$16 sps:$4 sm:$0xff]  }
  0x9e   :  { %1763 = vmatpush1.bf16.msra.mxu0 %v3188_v42  ;;  %v3272_v42 = vld [vmem:[#allocation5 + $0x48] ss:$16 sps:$4 sm:$0xff]  }
  0x9f   :  { %1804 = vmatpush1.bf16.msra.mxu1 %v3191_v43  ;;  %1764 = vmatprep.subr.bf16.mxu0 %v3196_v44  ;;  %v3275_v43 = vld [vmem:[#allocation5 + $0x248] ss:$16 sps:$4 sm:$0xff]   ;;  %v3280_v44 = vld [vmem:[#allocation5 + $0x2c] ss:$16 sps:$4 sm:$0xff]  }
  0xa0   :  { %1805 = vmatprep.subr.bf16.mxu1 %v3199_v45  ;;  %v3283_v45 = vld [vmem:[#allocation5 + $0x22c] ss:$16 sps:$4 sm:$0xff]  }
  0xa2   :  { %1765 = vmatpush2.bf16.msra.mxu0 %v3194_v46  ;;  %v3278_v46 = vld [vmem:[#allocation5 + $0x28] ss:$16 sps:$4 sm:$0xff]  }
  0xa3   :  { %1806 = vmatpush2.bf16.msra.mxu1 %v3197_v47  ;;  %1766 = vmatprep.subr.bf16.mxu0 %v3202_v48  ;;  %v3281_v47 = vld [vmem:[#allocation5 + $0x228] ss:$16 sps:$4 sm:$0xff]   ;;  %v3286_v48 = vld [vmem:[#allocation5 + $0xc] ss:$16 sps:$4 sm:$0xff]  }
  0xa4   :  { %1807 = vmatprep.subr.bf16.mxu1 %v3205_v50  ;;  %v3289_v50 = vld [vmem:[#allocation5 + $0x20c] ss:$16 sps:$4 sm:$0xff]  }
  0xa6   :  { %1767 = vmatpush2.bf16.msra.mxu0 %v3200_v51  ;;  %v3284_v51 = vld [vmem:[#allocation5 + $0x8] ss:$16 sps:$4 sm:$0xff]  }
  0xa7   :  { %1808 = vmatpush2.bf16.msra.mxu1 %v3203_v53  ;;  %1768 = vmatprep.subr.bf16.mxu0 %v3208_v54  ;;  %v3287_v53 = vld [vmem:[#allocation5 + $0x208] ss:$16 sps:$4 sm:$0xff]   ;;  %v3292_v54 = vld [vmem:[#allocation5 + $0x1ec] ss:$16 sps:$4 sm:$0xff]  }
  0xa8   :  { %1809 = vmatprep.subr.bf16.mxu1 %v3211_v55  ;;  %v3295_v55 = vld [vmem:[#allocation5 + $0x3ec] ss:$16 sps:$4 sm:$0xff]  }
  0xaa   :  { %1769 = vmatpush2.bf16.msra.mxu0 %v3206_v56  ;;  %v3290_v56 = vld [vmem:[#allocation5 + $0x1e8] ss:$16 sps:$4 sm:$0xff]  }
  0xab   :  { %1810 = vmatpush2.bf16.msra.mxu1 %v3209_v57  ;;  %1770 = vmatprep.subr.bf16.mxu0 %v3214_v58  ;;  %v3293_v57 = vld [vmem:[#allocation5 + $0x3e8] ss:$16 sps:$4 sm:$0xff]   ;;  %v3298_v58 = vld [vmem:[#allocation5 + $0x1cc] ss:$16 sps:$4 sm:$0xff]  }
  0xac   :  { %1811 = vmatprep.subr.bf16.mxu1 %v3217_v59  ;;  %v3301_v59 = vld [vmem:[#allocation5 + $0x3cc] ss:$16 sps:$4 sm:$0xff]  }
  0xae   :  { %1771 = vmatpush2.bf16.msra.mxu0 %v3212_v60  ;;  %v3296_v60 = vld [vmem:[#allocation5 + $0x1c8] ss:$16 sps:$4 sm:$0xff]  }
  0xaf   :  { %1812 = vmatpush2.bf16.msra.mxu1 %v3215_v61  ;;  %1772 = vmatprep.subr.bf16.mxu0 %v3220_v62  ;;  %v3299_v61 = vld [vmem:[#allocation5 + $0x3c8] ss:$16 sps:$4 sm:$0xff]   ;;  %v3304_v62 = vld [vmem:[#allocation5 + $0x1ac] ss:$16 sps:$4 sm:$0xff]  }
  0xb0   :  { %1813 = vmatprep.subr.bf16.mxu1 %v3223_v63  ;;  %v3307_v63 = vld [vmem:[#allocation5 + $0x3ac] ss:$16 sps:$4 sm:$0xff]  }
  0xb2   :  { %1773 = vmatpush2.bf16.msra.mxu0 %v3218_v0  ;;  %v3302_v0 = vld [vmem:[#allocation5 + $0x1a8] ss:$16 sps:$4 sm:$0xff]  }
  0xb3   :  { %1814 = vmatpush2.bf16.msra.mxu1 %v3221_v1  ;;  %1774 = vmatprep.subr.bf16.mxu0 %v3226_v2  ;;  %v3305_v1 = vld [vmem:[#allocation5 + $0x3a8] ss:$16 sps:$4 sm:$0xff]   ;;  %v3310_v2 = vld [vmem:[#allocation5 + $0x18c] ss:$16 sps:$4 sm:$0xff]  }
  0xb4   :  { %1815 = vmatprep.subr.bf16.mxu1 %v3229_v3  ;;  %v3313_v3 = vld [vmem:[#allocation5 + $0x38c] ss:$16 sps:$4 sm:$0xff]  }
  0xb6   :  { %1775 = vmatpush2.bf16.msra.mxu0 %v3224_v4  ;;  %v3308_v4 = vld [vmem:[#allocation5 + $0x188] ss:$16 sps:$4 sm:$0xff]  }
  0xb7   :  { %1816 = vmatpush2.bf16.msra.mxu1 %v3227_v5  ;;  %1776 = vmatprep.subr.bf16.mxu0 %v3232_v6  ;;  %v3311_v5 = vld [vmem:[#allocation5 + $0x388] ss:$16 sps:$4 sm:$0xff]   ;;  %v3316_v6 = vld [vmem:[#allocation5 + $0x16c] ss:$16 sps:$4 sm:$0xff]  }
  0xb8   :  { %1817 = vmatprep.subr.bf16.mxu1 %v3235_v7  ;;  %v3319_v7 = vld [vmem:[#allocation5 + $0x36c] ss:$16 sps:$4 sm:$0xff]  }
  0xba   :  { %1777 = vmatpush2.bf16.msra.mxu0 %v3230_v10  ;;  %v3314_v10 = vld [vmem:[#allocation5 + $0x168] ss:$16 sps:$4 sm:$0xff]  }
  0xbb   :  { %1818 = vmatpush2.bf16.msra.mxu1 %v3233_v11  ;;  %1778 = vmatprep.subr.bf16.mxu0 %v3238_v12  ;;  %v3317_v11 = vld [vmem:[#allocation5 + $0x368] ss:$16 sps:$4 sm:$0xff]   ;;  %v3322_v12 = vld [vmem:[#allocation5 + $0x14c] ss:$16 sps:$4 sm:$0xff]  }
  0xbc   :  { %1819 = vmatprep.subr.bf16.mxu1 %v3241_v13  ;;  %v3325_v13 = vld [vmem:[#allocation5 + $0x34c] ss:$16 sps:$4 sm:$0xff]  }
  0xbe   :  { %1779 = vmatpush2.bf16.msra.mxu0 %v3236_v14  ;;  %v3320_v14 = vld [vmem:[#allocation5 + $0x148] ss:$16 sps:$4 sm:$0xff]  }
  0xbf   :  { %1820 = vmatpush2.bf16.msra.mxu1 %v3239_v15  ;;  %1830 = vmatprep.subr.bf16.mxu0 %v3244_v18  ;;  %v3323_v15 = vld [vmem:[#allocation5 + $0x348] ss:$16 sps:$4 sm:$0xff]  }
  0xc0   :  { %1871 = vmatprep.subr.bf16.mxu1 %v3247_v19  ;;  %v3326_v18 = vld [vmem:[#allocation5 + $0x128] ss:$16 sps:$4 sm:$0xff]  }
  0xc1   :  { %1781 = vmatmul.mubr.bf16.vlgmr.msra.gmra.mxu0 %v3761_v20  ;;  %v3329_v19 = vld [vmem:[#allocation5 + $0x328] ss:$16 sps:$4 sm:$0xff]  }
  0xc2   :  { %1822 = vmatmul.mubr.bf16.vlgmr.msra.gmra.mxu1 %v3763_v21  ;;  %1831 = vmatpush1.bf16.msra.mxu0 %v3242_v22  ;;  %v3334_v22 = vld [vmem:[#allocation5 + $0x10c] ss:$16 sps:$4 sm:$0xff]  }
  0xc3   :  { %1872 = vmatpush1.bf16.msra.mxu1 %v3245_v23  ;;  %1832 = vmatprep.subr.bf16.mxu0 %v3250_v24  ;;  %v3337_v23 = vld [vmem:[#allocation5 + $0x30c] ss:$16 sps:$4 sm:$0xff]   ;;  %v3332_v24 = vld [vmem:[#allocation5 + $0x108] ss:$16 sps:$4 sm:$0xff]  }
  0xc4   :  { %1873 = vmatprep.subr.bf16.mxu1 %v3253_v25  ;;  %1862 = vmatprep.mubr.bf16.mxu0 %v3743_v49  ;;  %v3269_v49 = vld [vmem:[#allocation5 + $0x268] ss:$16 sps:$4 sm:$0xff]  }
  0xc5   :  { %1903 = vmatprep.mubr.bf16.mxu1 %v3745_v52  ;;  %v3274_v52 = vld [vmem:[#allocation5 + $0x4c] ss:$16 sps:$4 sm:$0xff]   ;;  %v3335_v25 = vld [vmem:[#allocation5 + $0x308] ss:$16 sps:$4 sm:$0xff]  }
  0xc6   :  { %1833 = vmatpush1.bf16.msra.mxu0 %v3248_v26  ;;  %v3340_v26 = vld [vmem:[#allocation5 + $0x4ec] ss:$16 sps:$4 sm:$0xff]  }
  0xc7   :  { %1874 = vmatpush1.bf16.msra.mxu1 %v3251_v27  ;;  %1834 = vmatprep.subr.bf16.mxu0 %v3256_v28  ;;  %v3343_v27 = vld [vmem:[#allocation5 + $0x6ec] ss:$16 sps:$4 sm:$0xff]   ;;  %v3338_v28 = vld [vmem:[#allocation5 + $0x4e8] ss:$16 sps:$4 sm:$0xff]  }
  0xc8   :  { %1875 = vmatprep.subr.bf16.mxu1 %v3259_v29  ;;  %v3341_v29 = vld [vmem:[#allocation5 + $0x6e8] ss:$16 sps:$4 sm:$0xff]  }
  0xca   :  { %1835 = vmatpush1.bf16.msra.mxu0 %v3254_v30  ;;  %v3346_v30 = vld [vmem:[#allocation5 + $0x4cc] ss:$16 sps:$4 sm:$0xff]  }
  0xcb   :  { %1876 = vmatpush1.bf16.msra.mxu1 %v3257_v31  ;;  %1836 = vmatprep.subr.bf16.mxu0 %v3262_v32  ;;  %v3349_v31 = vld [vmem:[#allocation5 + $0x6cc] ss:$16 sps:$4 sm:$0xff]   ;;  %v3344_v32 = vld [vmem:[#allocation5 + $0x4c8] ss:$16 sps:$4 sm:$0xff]  }
  0xcc   :  { %1877 = vmatprep.subr.bf16.mxu1 %v3265_v33  ;;  %v3347_v33 = vld [vmem:[#allocation5 + $0x6c8] ss:$16 sps:$4 sm:$0xff]  }
  0xce   :  { %1837 = vmatpush1.bf16.msra.mxu0 %v3260_v34  ;;  %v3352_v34 = vld [vmem:[#allocation5 + $0x4ac] ss:$16 sps:$4 sm:$0xff]  }
  0xcf   :  { %1878 = vmatpush1.bf16.msra.mxu1 %v3263_v35  ;;  %1838 = vmatprep.subr.bf16.mxu0 %v3268_v36  ;;  %v3355_v35 = vld [vmem:[#allocation5 + $0x6ac] ss:$16 sps:$4 sm:$0xff]   ;;  %v3350_v36 = vld [vmem:[#allocation5 + $0x4a8] ss:$16 sps:$4 sm:$0xff]  }
  0xd0   :  { %1879 = vmatprep.subr.bf16.mxu1 %v3271_v38  ;;  %v3353_v38 = vld [vmem:[#allocation5 + $0x6a8] ss:$16 sps:$4 sm:$0xff]  }
  0xd2   :  { %1839 = vmatpush1.bf16.msra.mxu0 %v3266_v39  ;;  %v3358_v39 = vld [vmem:[#allocation5 + $0x48c] ss:$16 sps:$4 sm:$0xff]  }
  0xd3   :  { %1880 = vmatpush1.bf16.msra.mxu1 %v3269_v49  ;;  %1840 = vmatprep.subr.bf16.mxu0 %v3274_v52  ;;  %v3356_v49 = vld [vmem:[#allocation5 + $0x488] ss:$16 sps:$4 sm:$0xff]   ;;  %v3364_v52 = vld [vmem:[#allocation5 + $0x46c] ss:$16 sps:$4 sm:$0xff]  }
  0xd4   :  { %1881 = vmatprep.subr.bf16.mxu1 %v3277_v41  ;;  %v3367_v41 = vld [vmem:[#allocation5 + $0x66c] ss:$16 sps:$4 sm:$0xff]  }
  0xd6   :  { %1841 = vmatpush1.bf16.msra.mxu0 %v3272_v42  ;;  %v3362_v42 = vld [vmem:[#allocation5 + $0x468] ss:$16 sps:$4 sm:$0xff]  }
  0xd7   :  { %1882 = vmatpush1.bf16.msra.mxu1 %v3275_v43  ;;  %1842 = vmatprep.subr.bf16.mxu0 %v3280_v44  ;;  %v3365_v43 = vld [vmem:[#allocation5 + $0x668] ss:$16 sps:$4 sm:$0xff]   ;;  %v3370_v44 = vld [vmem:[#allocation5 + $0x44c] ss:$16 sps:$4 sm:$0xff]  }
  0xd8   :  { %1883 = vmatprep.subr.bf16.mxu1 %v3283_v45  ;;  %v3371_v45 = vld [vmem:[#allocation5 + $0x648] ss:$16 sps:$4 sm:$0xff]  }
  0xda   :  { %1843 = vmatpush1.bf16.msra.mxu0 %v3278_v46  ;;  %v3376_v46 = vld [vmem:[#allocation5 + $0x42c] ss:$16 sps:$4 sm:$0xff]  }
  0xdb   :  { %1884 = vmatpush1.bf16.msra.mxu1 %v3281_v47  ;;  %1844 = vmatprep.subr.bf16.mxu0 %v3286_v48  ;;  %v3379_v47 = vld [vmem:[#allocation5 + $0x62c] ss:$16 sps:$4 sm:$0xff]   ;;  %v3374_v48 = vld [vmem:[#allocation5 + $0x428] ss:$16 sps:$4 sm:$0xff]  }
  0xdc   :  { %1885 = vmatprep.subr.bf16.mxu1 %v3289_v50  ;;  %v3377_v50 = vld [vmem:[#allocation5 + $0x628] ss:$16 sps:$4 sm:$0xff]  }
  0xde   :  { %1845 = vmatpush1.bf16.msra.mxu0 %v3284_v51  ;;  %v3382_v51 = vld [vmem:[#allocation5 + $0x40c] ss:$16 sps:$4 sm:$0xff]  }
  0xdf   :  { %1886 = vmatpush1.bf16.msra.mxu1 %v3287_v53  ;;  %1846 = vmatprep.subr.bf16.mxu0 %v3292_v54  ;;  %v3385_v53 = vld [vmem:[#allocation5 + $0x60c] ss:$16 sps:$4 sm:$0xff]   ;;  %v3380_v54 = vld [vmem:[#allocation5 + $0x408] ss:$16 sps:$4 sm:$0xff]  }
  0xe0   :  { %1887 = vmatprep.subr.bf16.mxu1 %v3295_v55  ;;  %v3383_v55 = vld [vmem:[#allocation5 + $0x608] ss:$16 sps:$4 sm:$0xff]  }
  0xe2   :  { %1847 = vmatpush2.bf16.msra.mxu0 %v3290_v56  ;;  %v3388_v56 = vld [vmem:[#allocation5 + $0x5ec] ss:$16 sps:$4 sm:$0xff]  }
  0xe3   :  { %1888 = vmatpush2.bf16.msra.mxu1 %v3293_v57  ;;  %1848 = vmatprep.subr.bf16.mxu0 %v3298_v58  ;;  %v3391_v57 = vld [vmem:[#allocation5 + $0x7ec] ss:$16 sps:$4 sm:$0xff]   ;;  %v3386_v58 = vld [vmem:[#allocation5 + $0x5e8] ss:$16 sps:$4 sm:$0xff]  }
  0xe4   :  { %1889 = vmatprep.subr.bf16.mxu1 %v3301_v59  ;;  %v3389_v59 = vld [vmem:[#allocation5 + $0x7e8] ss:$16 sps:$4 sm:$0xff]  }
  0xe6   :  { %1849 = vmatpush2.bf16.msra.mxu0 %v3296_v60  ;;  %v3394_v60 = vld [vmem:[#allocation5 + $0x5cc] ss:$16 sps:$4 sm:$0xff]  }
  0xe7   :  { %1890 = vmatpush2.bf16.msra.mxu1 %v3299_v61  ;;  %1850 = vmatprep.subr.bf16.mxu0 %v3304_v62  ;;  %v3397_v61 = vld [vmem:[#allocation5 + $0x7cc] ss:$16 sps:$4 sm:$0xff]   ;;  %v3392_v62 = vld [vmem:[#allocation5 + $0x5c8] ss:$16 sps:$4 sm:$0xff]  }
  0xe8   :  { %1891 = vmatprep.subr.bf16.mxu1 %v3307_v63  ;;  %v3395_v63 = vld [vmem:[#allocation5 + $0x7c8] ss:$16 sps:$4 sm:$0xff]  }
  0xea   :  { %1851 = vmatpush2.bf16.msra.mxu0 %v3302_v0  ;;  %v3400_v0 = vld [vmem:[#allocation5 + $0x5ac] ss:$16 sps:$4 sm:$0xff]  }
  0xeb   :  { %1892 = vmatpush2.bf16.msra.mxu1 %v3305_v1  ;;  %1852 = vmatprep.subr.bf16.mxu0 %v3310_v2  ;;  %v3403_v1 = vld [vmem:[#allocation5 + $0x7ac] ss:$16 sps:$4 sm:$0xff]   ;;  %v3398_v2 = vld [vmem:[#allocation5 + $0x5a8] ss:$16 sps:$4 sm:$0xff]  }
  0xec   :  { %1893 = vmatprep.subr.bf16.mxu1 %v3313_v3  ;;  %v3401_v3 = vld [vmem:[#allocation5 + $0x7a8] ss:$16 sps:$4 sm:$0xff]  }
  0xee   :  { %1853 = vmatpush2.bf16.msra.mxu0 %v3308_v4  ;;  %v3406_v4 = vld [vmem:[#allocation5 + $0x58c] ss:$16 sps:$4 sm:$0xff]  }
  0xef   :  { %1894 = vmatpush2.bf16.msra.mxu1 %v3311_v5  ;;  %1854 = vmatprep.subr.bf16.mxu0 %v3316_v6  ;;  %v3409_v5 = vld [vmem:[#allocation5 + $0x78c] ss:$16 sps:$4 sm:$0xff]   ;;  %v3404_v6 = vld [vmem:[#allocation5 + $0x588] ss:$16 sps:$4 sm:$0xff]  }
  0xf0   :  { %1895 = vmatprep.subr.bf16.mxu1 %v3319_v7  ;;  %v3407_v7 = vld [vmem:[#allocation5 + $0x788] ss:$16 sps:$4 sm:$0xff]  }
  0xf2   :  { %1855 = vmatpush2.bf16.msra.mxu0 %v3314_v10  ;;  %v3412_v10 = vld [vmem:[#allocation5 + $0x56c] ss:$16 sps:$4 sm:$0xff]  }
  0xf3   :  { %1896 = vmatpush2.bf16.msra.mxu1 %v3317_v11  ;;  %1856 = vmatprep.subr.bf16.mxu0 %v3322_v12  ;;  %v3415_v11 = vld [vmem:[#allocation5 + $0x76c] ss:$16 sps:$4 sm:$0xff]   ;;  %v3410_v12 = vld [vmem:[#allocation5 + $0x568] ss:$16 sps:$4 sm:$0xff]  }
  0xf4   :  { %1897 = vmatprep.subr.bf16.mxu1 %v3325_v13  ;;  %v3413_v13 = vld [vmem:[#allocation5 + $0x768] ss:$16 sps:$4 sm:$0xff]  }
  0xf6   :  { %1857 = vmatpush2.bf16.msra.mxu0 %v3320_v14  ;;  %v3418_v14 = vld [vmem:[#allocation5 + $0x54c] ss:$16 sps:$4 sm:$0xff]  }
  0xf7   :  { %1898 = vmatpush2.bf16.msra.mxu1 %v3323_v15  ;;  %1858 = vmatprep.subr.bf16.mxu0 %v3328_v16  ;;  %v3421_v15 = vld [vmem:[#allocation5 + $0x74c] ss:$16 sps:$4 sm:$0xff]   ;;  %v3416_v16 = vld [vmem:[#allocation5 + $0x548] ss:$16 sps:$4 sm:$0xff]  }
  0xf8   :  { %1899 = vmatprep.subr.bf16.mxu1 %v3331_v17  ;;  %v3419_v17 = vld [vmem:[#allocation5 + $0x748] ss:$16 sps:$4 sm:$0xff]  }
  0xfa   :  { %1859 = vmatpush2.bf16.msra.mxu0 %v3326_v18  ;;  %v3424_v18 = vld [vmem:[#allocation5 + $0x52c] ss:$16 sps:$4 sm:$0xff]  }
  0xfb   :  { %1900 = vmatpush2.bf16.msra.mxu1 %v3329_v19  ;;  %1860 = vmatprep.subr.bf16.mxu0 %v3334_v22  ;;  %v3427_v19 = vld [vmem:[#allocation5 + $0x72c] ss:$16 sps:$4 sm:$0xff]   ;;  %v3422_v22 = vld [vmem:[#allocation5 + $0x528] ss:$16 sps:$4 sm:$0xff]  }
  0xfc   :  { %1901 = vmatprep.subr.bf16.mxu1 %v3337_v23  ;;  %v3425_v23 = vld [vmem:[#allocation5 + $0x728] ss:$16 sps:$4 sm:$0xff]  }
  0xfe   :  { %1861 = vmatpush2.bf16.msra.mxu0 %v3332_v24  ;;  %v3430_v24 = vld [vmem:[#allocation5 + $0x50c] ss:$16 sps:$4 sm:$0xff]  }
  0xff   :  { %1902 = vmatpush2.bf16.msra.mxu1 %v3335_v25  ;;  %1912 = vmatprep.subr.bf16.mxu0 %v3340_v26  ;;  %v3433_v25 = vld [vmem:[#allocation5 + $0x70c] ss:$16 sps:$4 sm:$0xff]   ;;  %v3428_v26 = vld [vmem:[#allocation5 + $0x508] ss:$16 sps:$4 sm:$0xff]  }
 0x100   :  { %1953 = vmatprep.subr.bf16.mxu1 %v3343_v27  ;;  %v3431_v27 = vld [vmem:[#allocation5 + $0x708] ss:$16 sps:$4 sm:$0xff]  }
 0x101   :  { %1863 = vmatmul.mubr.bf16.vlgmr.msra.gmra.mxu0 %v3749_v8  ;;  %v3361_v8 = vld [vmem:[#allocation5 + $0x68c] ss:$16 sps:$4 sm:$0xff]  }
 0x102   :  { %1904 = vmatmul.mubr.bf16.vlgmr.msra.gmra.mxu1 %v3751_v9  ;;  %1913 = vmatpush1.bf16.msra.mxu0 %v3338_v28  ;;  %v3359_v9 = vld [vmem:[#allocation5 + $0x688] ss:$16 sps:$4 sm:$0xff]  }
 0x103   :  { %1954 = vmatpush1.bf16.msra.mxu1 %v3341_v29  ;;  %1914 = vmatprep.subr.bf16.mxu0 %v3346_v30  ;;  %v3436_v28 = vld [vmem:[#allocation8 + $0x74] ss:$8 sps:$4 sm:$0xff]   ;;  %v3434_v29 = vld [vmem:[#allocation8 + $0x70] ss:$8 sps:$4 sm:$0xff]   ;;  %v3439_v30 = vld [vmem:[#allocation8 + $0x64] ss:$8 sps:$4 sm:$0xff]  }
 0x104   :  { %1955 = vmatprep.subr.bf16.mxu1 %v3349_v31  ;;  %1944 = vmatprep.mubr.bf16.mxu0 %v3755_v37  ;;  %v3373_v37 = vld [vmem:[#allocation5 + $0x64c] ss:$16 sps:$4 sm:$0xff]  }
 0x105   :  { %1985 = vmatprep.mubr.bf16.mxu1 %v3757_v40  ;;  %v3368_v40 = vld [vmem:[#allocation5 + $0x448] ss:$16 sps:$4 sm:$0xff]  }
 0x106   :  { %1915 = vmatpush1.bf16.msra.mxu0 %v3344_v32 }
 0x107   :  { %1956 = vmatpush1.bf16.msra.mxu1 %v3347_v33  ;;  %1916 = vmatprep.subr.bf16.mxu0 %v3352_v34  ;;  %v3437_v33 = vld [vmem:[#allocation8 + $0x60] ss:$8 sps:$4 sm:$0xff]  }
 0x108   :  { %1957 = vmatprep.subr.bf16.mxu1 %v3355_v35 }
 0x10a   :  { %1917 = vmatpush1.bf16.msra.mxu0 %v3350_v36  ;;  %v3442_v36 = vld [vmem:[#allocation8 + $0x54] ss:$8 sps:$4 sm:$0xff]  }
 0x10b   :  { %1958 = vmatpush1.bf16.msra.mxu1 %v3353_v38  ;;  %1918 = vmatprep.subr.bf16.mxu0 %v3358_v39 }
 0x10c   :  { %1959 = vmatprep.subr.bf16.mxu1 %v3361_v8  ;;  %v3440_v8 = vld [vmem:[#allocation8 + $0x50] ss:$8 sps:$4 sm:$0xff]  }
 0x10e   :  { %1919 = vmatpush1.bf16.msra.mxu0 %v3356_v49 }
 0x10f   :  { %1960 = vmatpush1.bf16.msra.mxu1 %v3359_v9  ;;  %1920 = vmatprep.subr.bf16.mxu0 %v3364_v52  ;;  %v3445_v52 = vld [vmem:[#allocation8 + $0x44] ss:$8 sps:$4 sm:$0xff]  }
 0x110   :  { %1961 = vmatprep.subr.bf16.mxu1 %v3367_v41  ;;  %v3482_v41 = vld [vmem:[#allocation8 + $0x170] ss:$8 sps:$4 sm:$0xff]  }
 0x112   :  { %1921 = vmatpush1.bf16.msra.mxu0 %v3362_v42  ;;  %v3487_v42 = vld [vmem:[#allocation8 + $0x164] ss:$8 sps:$4 sm:$0xff]  }
 0x113   :  { %1962 = vmatpush1.bf16.msra.mxu1 %v3365_v43  ;;  %1922 = vmatprep.subr.bf16.mxu0 %v3370_v44  ;;  %v3485_v43 = vld [vmem:[#allocation8 + $0x160] ss:$8 sps:$4 sm:$0xff]   ;;  %v3448_v44 = vld [vmem:[#allocation8 + $0x34] ss:$8 sps:$4 sm:$0xff]  }
 0x114   :  { %1963 = vmatprep.subr.bf16.mxu1 %v3373_v37  ;;  %v3490_v37 = vld [vmem:[#allocation8 + $0x154] ss:$8 sps:$4 sm:$0xff]  }
 0x116   :  { %1923 = vmatpush1.bf16.msra.mxu0 %v3368_v40  ;;  %v3446_v40 = vld [vmem:[#allocation8 + $0x30] ss:$8 sps:$4 sm:$0xff]  }
 0x117   :  { %1964 = vmatpush1.bf16.msra.mxu1 %v3371_v45  ;;  %1924 = vmatprep.subr.bf16.mxu0 %v3376_v46  ;;  %v3488_v45 = vld [vmem:[#allocation8 + $0x150] ss:$8 sps:$4 sm:$0xff]   ;;  %v3451_v46 = vld [vmem:[#allocation8 + $0x24] ss:$8 sps:$4 sm:$0xff]  }
 0x118   :  { %1965 = vmatprep.subr.bf16.mxu1 %v3379_v47  ;;  %v3493_v47 = vld [vmem:[#allocation8 + $0x144] ss:$8 sps:$4 sm:$0xff]  }
 0x11a   :  { %1925 = vmatpush1.bf16.msra.mxu0 %v3374_v48  ;;  %v3449_v48 = vld [vmem:[#allocation8 + $0x20] ss:$8 sps:$4 sm:$0xff]  }
 0x11b   :  { %1966 = vmatpush1.bf16.msra.mxu1 %v3377_v50  ;;  %1926 = vmatprep.subr.bf16.mxu0 %v3382_v51  ;;  %v3491_v50 = vld [vmem:[#allocation8 + $0x140] ss:$8 sps:$4 sm:$0xff]   ;;  %v3454_v51 = vld [vmem:[#allocation8 + $0x14] ss:$8 sps:$4 sm:$0xff]  }
 0x11c   :  { %1967 = vmatprep.subr.bf16.mxu1 %v3385_v53  ;;  %v3496_v53 = vld [vmem:[#allocation8 + $0x134] ss:$8 sps:$4 sm:$0xff]  }
 0x11e   :  { %1927 = vmatpush1.bf16.msra.mxu0 %v3380_v54  ;;  %v3452_v54 = vld [vmem:[#allocation8 + $0x10] ss:$8 sps:$4 sm:$0xff]  }
 0x11f   :  { %1968 = vmatpush1.bf16.msra.mxu1 %v3383_v55  ;;  %1928 = vmatprep.subr.bf16.mxu0 %v3388_v56  ;;  %v3494_v55 = vld [vmem:[#allocation8 + $0x130] ss:$8 sps:$4 sm:$0xff]   ;;  %v3457_v56 = vld [vmem:[#allocation8 + $0x4] ss:$8 sps:$4 sm:$0xff]  }
 0x120   :  { %1969 = vmatprep.subr.bf16.mxu1 %v3391_v57  ;;  %v3499_v57 = vld [vmem:[#allocation8 + $0x124] ss:$8 sps:$4 sm:$0xff]  }
 0x122   :  { %1929 = vmatpush2.bf16.msra.mxu0 %v3386_v58  ;;  %v3455_v58 = vld [vmem:[#allocation8] ss:$8 sps:$4 sm:$0xff]  }
 0x123   :  { %1970 = vmatpush2.bf16.msra.mxu1 %v3389_v59  ;;  %1930 = vmatprep.subr.bf16.mxu0 %v3394_v60  ;;  %v3497_v59 = vld [vmem:[#allocation8 + $0x120] ss:$8 sps:$4 sm:$0xff]   ;;  %v3460_v60 = vld [vmem:[#allocation8 + $0xf4] ss:$8 sps:$4 sm:$0xff]  }
 0x124   :  { %1971 = vmatprep.subr.bf16.mxu1 %v3397_v61  ;;  %v3502_v61 = vld [vmem:[#allocation8 + $0x114] ss:$8 sps:$4 sm:$0xff]  }
 0x126   :  { %1931 = vmatpush2.bf16.msra.mxu0 %v3392_v62  ;;  %v3458_v62 = vld [vmem:[#allocation8 + $0xf0] ss:$8 sps:$4 sm:$0xff]  }
 0x127   :  { %1972 = vmatpush2.bf16.msra.mxu1 %v3395_v63  ;;  %1932 = vmatprep.subr.bf16.mxu0 %v3400_v0  ;;  %v3500_v63 = vld [vmem:[#allocation8 + $0x110] ss:$8 sps:$4 sm:$0xff]   ;;  %v3463_v0 = vld [vmem:[#allocation8 + $0xe4] ss:$8 sps:$4 sm:$0xff]  }
 0x128   :  { %1973 = vmatprep.subr.bf16.mxu1 %v3403_v1  ;;  %v3505_v1 = vld [vmem:[#allocation8 + $0x104] ss:$8 sps:$4 sm:$0xff]  }
 0x12a   :  { %1933 = vmatpush2.bf16.msra.mxu0 %v3398_v2  ;;  %v3461_v2 = vld [vmem:[#allocation8 + $0xe0] ss:$8 sps:$4 sm:$0xff]  }
 0x12b   :  { %1974 = vmatpush2.bf16.msra.mxu1 %v3401_v3  ;;  %1934 = vmatprep.subr.bf16.mxu0 %v3406_v4  ;;  %v3503_v3 = vld [vmem:[#allocation8 + $0x100] ss:$8 sps:$4 sm:$0xff]   ;;  %v3466_v4 = vld [vmem:[#allocation8 + $0xd4] ss:$8 sps:$4 sm:$0xff]  }
 0x12c   :  { %1975 = vmatprep.subr.bf16.mxu1 %v3409_v5  ;;  %v3508_v5 = vld [vmem:[#allocation8 + $0x1f4] ss:$8 sps:$4 sm:$0xff]  }
 0x12e   :  { %1935 = vmatpush2.bf16.msra.mxu0 %v3404_v6  ;;  %v3464_v6 = vld [vmem:[#allocation8 + $0xd0] ss:$8 sps:$4 sm:$0xff]  }
 0x12f   :  { %1976 = vmatpush2.bf16.msra.mxu1 %v3407_v7  ;;  %1936 = vmatprep.subr.bf16.mxu0 %v3412_v10  ;;  %v3506_v7 = vld [vmem:[#allocation8 + $0x1f0] ss:$8 sps:$4 sm:$0xff]   ;;  %v3469_v10 = vld [vmem:[#allocation8 + $0xc4] ss:$8 sps:$4 sm:$0xff]  }
 0x130   :  { %1977 = vmatprep.subr.bf16.mxu1 %v3415_v11  ;;  %v3511_v11 = vld [vmem:[#allocation8 + $0x1e4] ss:$8 sps:$4 sm:$0xff]  }
 0x132   :  { %1937 = vmatpush2.bf16.msra.mxu0 %v3410_v12  ;;  %v3467_v12 = vld [vmem:[#allocation8 + $0xc0] ss:$8 sps:$4 sm:$0xff]  }
 0x133   :  { %1978 = vmatpush2.bf16.msra.mxu1 %v3413_v13  ;;  %1938 = vmatprep.subr.bf16.mxu0 %v3418_v14  ;;  %v3509_v13 = vld [vmem:[#allocation8 + $0x1e0] ss:$8 sps:$4 sm:$0xff]   ;;  %v3472_v14 = vld [vmem:[#allocation8 + $0xb4] ss:$8 sps:$4 sm:$0xff]  }
 0x134   :  { %1979 = vmatprep.subr.bf16.mxu1 %v3421_v15  ;;  %v3514_v15 = vld [vmem:[#allocation8 + $0x1d4] ss:$8 sps:$4 sm:$0xff]  }
 0x136   :  { %1939 = vmatpush2.bf16.msra.mxu0 %v3416_v16  ;;  %v366_v16 = vlaneseq }
 0x137   :  { %1980 = vmatpush2.bf16.msra.mxu1 %v3419_v17  ;;  %1940 = vmatprep.subr.bf16.mxu0 %v3424_v18  ;;  %v3470_v17 = vld [vmem:[#allocation8 + $0xb0] ss:$8 sps:$4 sm:$0xff]  }
 0x138   :  { %1981 = vmatprep.subr.bf16.mxu1 %v3427_v19  ;;  %v3512_v18 = vld [vmem:[#allocation8 + $0x1d0] ss:$8 sps:$4 sm:$0xff]   ;;  %v3475_v19 = vld [vmem:[#allocation8 + $0xa4] ss:$8 sps:$4 sm:$0xff]  }
 0x13a   :  { %1941 = vmatpush2.bf16.msra.mxu0 %v3422_v22  ;;  %v3517_v22 = vld [vmem:[#allocation8 + $0x1c4] ss:$8 sps:$4 sm:$0xff]  }
 0x13b   :  { %1982 = vmatpush2.bf16.msra.mxu1 %v3425_v23  ;;  %1942 = vmatprep.subr.bf16.mxu0 %v3430_v24  ;;  %v3783_v23 = vshrl.u32 %v366_v16, 7  ;;  %v3473_v24 = vld [vmem:[#allocation8 + $0xa0] ss:$8 sps:$4 sm:$0xff]   ;;  %v3541_v16 = vld [vmem:[#allocation10 + $0x10] sm:$0xff]  }
 0x13c   :  { %1983 = vmatprep.subr.bf16.mxu1 %v3433_v25  ;;  %v3515_v25 = vld [vmem:[#allocation8 + $0x1c0] ss:$8 sps:$4 sm:$0xff]  }
 0x13e   :  { %1943 = vmatpush2.bf16.msra.mxu0 %v3428_v26  ;;  %v3478_v26 = vld [vmem:[#allocation8 + $0x94] ss:$8 sps:$4 sm:$0xff]  }
 0x13f   :  { %1984 = vmatpush2.bf16.msra.mxu1 %v3431_v27  ;;  %2398 = vmatprep.subr.bf16.mxu0 %v3436_v28  ;;  %v3520_v27 = vld [vmem:[#allocation8 + $0x1b4] ss:$8 sps:$4 sm:$0xff]   ;;  %v368_v28 = vsub.s32 0, %v3783_v23 }
 0x141   :  { %v3773_v31 = vpop.f32.mrf.mxu0  ;;  %1945 = vmatmul.mubr.bf16.vlgmr.msra.gmra.mxu0 %v3761_v20  ;;  %v3484_v20 = vld [vmem:[#allocation8 + $0x174] ss:$8 sps:$4 sm:$0xff]  }
 0x142   :  { %v3775_v32 = vpop.f32.mrf.mxu1  ;;  %1986 = vmatmul.mubr.bf16.vlgmr.msra.gmra.mxu1 %v3763_v21  ;;  %2399 = vmatpush1.bf16.msra.mxu0 %v3434_v29  ;;  %v3443_v21 = vld [vmem:[#allocation8 + $0x40] ss:$8 sps:$4 sm:$0xff]   ;;  %v3786_v29 = vld [vmem:[#allocation7] sm:$0xf] }
 0x143   :  { %v3779_v34 = vpop.f32.mrf.mxu0  ;;  %2400 = vmatprep.subr.bf16.mxu0 %v3439_v30  ;;  %2439 = vmatprep.subr.bf16.mxu1 %v3484_v20  ;;  %v372_v30 = vsub.s32 1, %v3783_v23 }
 0x144   :  { %v3781_v35 = vpop.f32.mrf.mxu1  ;;  %2440 = vmatpush1.bf16.msra.mxu1 %v3482_v41  ;;  %v3523_v41 = vld [vmem:[#allocation8 + $0x1a4] ss:$8 sps:$4 sm:$0xff]  }
 0x145   :  { %v1704_v38 = vpop.f32.mrf.mxu0  ;;  %2441 = vmatprep.subr.bf16.mxu1 %v3487_v42  ;;  %v3521_v42 = vld [vmem:[#allocation8 + $0x1a0] ss:$8 sps:$4 sm:$0xff]  }
 0x146   :  { %v1745_v39 = vpop.f32.mrf.mxu1  ;;  %2401 = vmatpush1.bf16.msra.mxu0 %v3437_v33  ;;  %v3476_v33 = vld [vmem:[#allocation8 + $0x90] ss:$8 sps:$4 sm:$0xff]   ;;  %v3481_v38 = vld [vmem:[#allocation8 + $0x84] ss:$8 sps:$4 sm:$0xff]  }
 0x147   :  { %v1705_v49 = vpop.f32.mrf.mxu0  ;;  %2402 = vmatprep.subr.bf16.mxu0 %v3442_v36  ;;  %v3518_v36 = vld [vmem:[#allocation8 + $0x1b0] ss:$8 sps:$4 sm:$0xff]   ;;  %v369_v39 = vrot.slane %v3786_v29, %v368_v28 }
 0x148   :  { %v1746_v9 = vpop.f32.mrf.mxu1  ;;  %2442 = vmatpush1.bf16.msra.mxu1 %v3485_v43  ;;  %v3479_v49 = vld [vmem:[#allocation8 + $0x80] ss:$8 sps:$4 sm:$0xff]  }
 0x149   :  { %2443 = vmatprep.subr.bf16.mxu1 %v3490_v37  ;;  %v1701_v9 = vadd.f32 %v3773_v31, %v369_v39  ;;  %v3524_v31 = vld [vmem:[#allocation8 + $0x190] ss:$8 sps:$4 sm:$0xff]  }
 0x14a   :  { %2403 = vmatpush1.bf16.msra.mxu0 %v3440_v8  ;;  %v373_v8 = vrot.slane %v3786_v29, %v372_v30 }
 0x14b   :  { %2404 = vmatprep.subr.bf16.mxu0 %v3445_v52  ;;  %v1742_v20 = vadd.f32 %v3775_v32, %v1701_v9 }
 0x14c   :  { %2444 = vmatpush1.bf16.msra.mxu1 %v3488_v45  ;;  %v1703_v52 = vadd.f32 %v3779_v34, %v373_v8 }
 0x14d   :  { %2445 = vmatprep.subr.bf16.mxu1 %v3493_v47 }
 0x14e   :  { %2405 = vmatpush1.bf16.msra.mxu0 %v3443_v21 }
 0x14f   :  { %2406 = vmatprep.subr.bf16.mxu0 %v3448_v44  ;;  %v1744_v44 = vadd.f32 %v3781_v35, %v1703_v52 }
 0x150   :  { %2446 = vmatpush1.bf16.msra.mxu1 %v3491_v50 }
 0x151   :  { %2447 = vmatprep.subr.bf16.mxu1 %v3496_v53 }
 0x152   :  { %2407 = vmatpush1.bf16.msra.mxu0 %v3446_v40 }
 0x153   :  { %2408 = vmatprep.subr.bf16.mxu0 %v3451_v46  ;;  %v3526_v46 = vld [vmem:[#allocation8 + $0x194] ss:$8 sps:$4 sm:$0xff]  }
 0x154   :  { %2448 = vmatpush1.bf16.msra.mxu1 %v3494_v55  ;;  %v3529_v55 = vld [vmem:[#allocation8 + $0x184] ss:$8 sps:$4 sm:$0xff]  }
 0x155   :  { %2449 = vmatprep.subr.bf16.mxu1 %v3499_v57  ;;  %v3527_v57 = vld [vmem:[#allocation8 + $0x180] ss:$8 sps:$4 sm:$0xff]  }
 0x156   :  { %2409 = vmatpush1.bf16.msra.mxu0 %v3449_v48 }
 0x157   :  { %2410 = vmatprep.subr.bf16.mxu0 %v3454_v51 }
 0x158   :  { %2450 = vmatpush1.bf16.msra.mxu1 %v3497_v59 }
 0x159   :  { %2451 = vmatprep.subr.bf16.mxu1 %v3502_v61 }
 0x15a   :  { %2411 = vmatpush1.bf16.msra.mxu0 %v3452_v54 }
 0x15b   :  { %2412 = vmatprep.subr.bf16.mxu0 %v3457_v56 }
 0x15c   :  { %2452 = vmatpush1.bf16.msra.mxu1 %v3500_v63 }
 0x15d   :  { %2453 = vmatprep.subr.bf16.mxu1 %v3505_v1 }
 0x15e   :  { %2413 = vmatpush1.bf16.msra.mxu0 %v3455_v58 }
 0x15f   :  { %2414 = vmatprep.subr.bf16.mxu0 %v3460_v60 }
 0x160   :  { %2454 = vmatpush1.bf16.msra.mxu1 %v3503_v3  ;;  %v3530_v3 = vld [vmem:[#allocation10 + $0x78] sm:$0xff]  }
 0x161   :  { %2455 = vmatprep.subr.bf16.mxu1 %v3508_v5  ;;  %v3532_v5 = vld [vmem:[#allocation10 + $0x70] sm:$0xff]  }
 0x162   :  { %2415 = vmatpush2.bf16.msra.mxu0 %v3458_v62 }
 0x163   :  { %2416 = vmatprep.subr.bf16.mxu0 %v3463_v0 }
 0x164   :  { %2456 = vmatpush2.bf16.msra.mxu1 %v3506_v7  ;;  %v3534_v7 = vld [vmem:[#allocation10 + $0x68] sm:$0xff]  }
 0x165   :  { %2457 = vmatprep.subr.bf16.mxu1 %v3511_v11  ;;  %v3536_v11 = vld [vmem:[#allocation10 + $0x60] sm:$0xff]  }
 0x166   :  { %2417 = vmatpush2.bf16.msra.mxu0 %v3461_v2 }
 0x167   :  { %2418 = vmatprep.subr.bf16.mxu0 %v3466_v4  ;;  %v3531_v4 = vld [vmem:[#allocation10 + $0x38] sm:$0xff]  }
 0x168   :  { %2458 = vmatpush2.bf16.msra.mxu1 %v3509_v13  ;;  %v3538_v13 = vld [vmem:[#allocation10 + $0x58] sm:$0xff]  }
 0x169   :  { %2459 = vmatprep.subr.bf16.mxu1 %v3514_v15  ;;  %v3540_v15 = vld [vmem:[#allocation10 + $0x50] sm:$0xff]  }
 0x16a   :  { %2419 = vmatpush2.bf16.msra.mxu0 %v3464_v6  ;;  %v3533_v6 = vld [vmem:[#allocation10 + $0x30] sm:$0xff]  }
 0x16b   :  { %2420 = vmatprep.subr.bf16.mxu0 %v3469_v10  ;;  %v3535_v10 = vld [vmem:[#allocation10 + $0x28] sm:$0xff]  }
 0x16c   :  { %2460 = vmatpush2.bf16.msra.mxu1 %v3512_v18  ;;  %v380_v18 = vsub.s32 3, %v3783_v23 }
 0x16d   :  { %2461 = vmatprep.subr.bf16.mxu1 %v3517_v22 }
 0x16e   :  { %2421 = vmatpush2.bf16.msra.mxu0 %v3467_v12  ;;  %v3537_v12 = vld [vmem:[#allocation10 + $0x20] sm:$0xff]   ;;  %v381_v22 = vrot.slane %v3786_v29, %v380_v18 }
 0x16f   :  { %2422 = vmatprep.subr.bf16.mxu0 %v3472_v14  ;;  %v3539_v14 = vld [vmem:[#allocation10 + $0x18] sm:$0xff]  }
 0x170   :  { %2462 = vmatpush2.bf16.msra.mxu1 %v3515_v25 }
 0x171   :  { %2463 = vmatprep.subr.bf16.mxu1 %v3520_v27 }
 0x172   :  { %2423 = vmatpush2.bf16.msra.mxu0 %v3470_v17  ;;  %v376_v17 = vsub.s32 2, %v3783_v23  ;;  %v2999_v23 = vld [vmem:[%s3822_s6] ss:$0 sm:$0xff] }
 0x173   :  { %2424 = vmatprep.subr.bf16.mxu0 %v3475_v19 }
 0x174   :  { %2464 = vmatpush2.bf16.msra.mxu1 %v3518_v36  ;;  %v377_v19 = vrot.slane %v3786_v29, %v376_v17 }
 0x175   :  { %2465 = vmatprep.subr.bf16.mxu1 %v3523_v41 }
 0x176   :  { %2425 = vmatpush2.bf16.msra.mxu0 %v3473_v24 }
 0x177   :  { %2426 = vmatprep.subr.bf16.mxu0 %v3478_v26 }
 0x178   :  { %2466 = vmatpush2.bf16.msra.mxu1 %v3521_v42 }
 0x179   :  { %2467 = vmatprep.subr.bf16.mxu1 %v3526_v46  ;;  %v3543_v46 = vld [vmem:[#allocation10 + $0x8] sm:$0xff]  }
 0x17a   :  { %2427 = vmatpush2.bf16.msra.mxu0 %v3476_v33 }
 0x17b   :  { %2428 = vmatprep.subr.bf16.mxu0 %v3481_v38 }
 0x17c   :  { %2468 = vmatpush2.bf16.msra.mxu1 %v3524_v31  ;;  %v3544_v31 = vld [vmem:[#allocation10 + $0x40] sm:$0xff]  }
 0x17d   :  { %2469 = vmatprep.subr.bf16.mxu1 %v3529_v55 }
 0x17e   :  { %2429 = vmatpush2.bf16.msra.mxu0 %v3479_v49 }
 0x17f   :  { %3016 = vmatprep.subr.bf16.mxu0 %v3530_v3 }
 0x180   :  { %2470 = vmatpush2.bf16.msra.mxu1 %v3527_v57 }
 0x181   :  { %v1782_v21 = vpop.f32.mrf.mxu0 }
 0x182   :  { %v1823_v43 = vpop.f32.mrf.mxu1  ;;  %v1783_v37 = vadd.f32 %v1782_v21, %v1742_v20 }
 0x183   :  { %v1784_v40 = vpop.f32.mrf.mxu0 }
 0x184   :  { %v1825_v45 = vpop.f32.mrf.mxu1  ;;  %v1824_v47 = vadd.f32 %v1823_v43, %v1783_v37  ;;  %v1785_v48 = vadd.f32 %v1784_v40, %v1744_v44 }
 0x185   :  { %v1786_v50 = vpop.f32.mrf.mxu0 }
 0x186   :  { %v1827_v34 = vpop.f32.mrf.mxu1  ;;  %v1826_v51 = vadd.f32 %v1825_v45, %v1785_v48  ;;  %v1994_v32 = vmax.f32 %v1824_v47, 0.0  ;;  %v3542_v45 = vld [vmem:[#allocation10 + $0x48] sm:$0xff]   ;;  %v3545_v50 = vld [vmem:[#allocation10] sm:$0xff]  }
 0x187   :  { %v1787_v53 = vpop.f32.mrf.mxu0 }
 0x188   :  { %v1828_v54 = vpop.f32.mrf.mxu1  ;;  %v1995_v56 = vmax.f32 %v1826_v51, 0.0  ;;  %v1998_v58 = vpack.c.bf16 %v1994_v32, %v1994_v32  ;;  %v2066_v51 = vld [vmem:[%s3820_s4] sm:$0x3] }
 0x189   :  { %v2071_v32 = vrot.slane %v2066_v51, %v368_v28  ;;  %v2075_v53 = vrot.slane %v2066_v51, %v372_v30 }
 0x18a   :  { %v1999_v35 = vpack.c.bf16 %v1995_v56, %v1995_v56 }
 0x18c   :  { %2430 = vmatprep.mubr.bf16.mxu0 %v1999_v35 }
 0x18d   :  { %2431 = vmatmul.mubr.bf16.vlgmr.msra.gmra.mxu0 %v1998_v58 }
 0x18e   :  { %3017 = vmatpush3.bf16.msra.mxu0 %v3531_v4 }
 0x18f   :  { %3018 = vmatprep.subr.bf16.mxu0 %v3532_v5 }
 0x192   :  { %3019 = vmatpush3.bf16.msra.mxu0 %v3533_v6 }
 0x193   :  { %3020 = vmatprep.subr.bf16.mxu0 %v3534_v7 }
 0x196   :  { %3021 = vmatpush3.bf16.msra.mxu0 %v3535_v10 }
 0x197   :  { %3022 = vmatprep.subr.bf16.mxu0 %v3536_v11 }
 0x19a   :  { %3023 = vmatpush3.bf16.msra.mxu0 %v3537_v12 }
 0x19b   :  { %3024 = vmatprep.subr.bf16.mxu0 %v3538_v13 }
 0x19e   :  { %3025 = vmatpush3.bf16.msra.mxu0 %v3539_v14 }
 0x19f   :  { %3026 = vmatprep.subr.bf16.mxu0 %v3540_v15 }
 0x1a2   :  { %3027 = vmatpush3.bf16.msra.mxu0 %v3541_v16 }
 0x1a3   :  { %3028 = vmatprep.subr.bf16.mxu0 %v3542_v45 }
 0x1a6   :  { %3029 = vmatpush3.bf16.msra.mxu0 %v3543_v46 }
 0x1a7   :  { %3030 = vmatprep.subr.bf16.mxu0 %v3544_v31 }
 0x1aa   :  { %3031 = vmatpush3.bf16.msra.mxu0 %v3545_v50 }
 0x1c1   :  { %v1864_v59 = vpop.f32.mrf.mxu0 }
 0x1c2   :  { %v1905_v60 = vpop.f32.mrf.mxu1  ;;  %v1865_v24 = vadd.f32 %v1864_v59, %v377_v19 }
 0x1c3   :  { %v1866_v61 = vpop.f32.mrf.mxu0 }
 0x1c4   :  { %v1907_v62 = vpop.f32.mrf.mxu1  ;;  %v1867_v25 = vadd.f32 %v1866_v61, %v381_v22  ;;  %v1906_v26 = vadd.f32 %v1905_v60, %v1865_v24 }
 0x1c5   :  { %v1868_v63 = vpop.f32.mrf.mxu0 }
 0x1c6   :  { %v1909_v0 = vpop.f32.mrf.mxu1  ;;  %v1908_v36 = vadd.f32 %v1907_v62, %v1867_v25 }
 0x1c7   :  { %v1869_v1 = vpop.f32.mrf.mxu0 }
 0x1c8   :  { %v1910_v2 = vpop.f32.mrf.mxu1 }
 0x201   :  { %v1946_v27 = vpop.f32.mrf.mxu0 }
 0x202   :  { %v1987_v33 = vpop.f32.mrf.mxu1  ;;  %v1947_v38 = vadd.f32 %v1946_v27, %v1906_v26 }
 0x203   :  { %v1948_v39 = vpop.f32.mrf.mxu0 }
 0x204   :  { %v1989_v8 = vpop.f32.mrf.mxu1  ;;  %v1988_v49 = vadd.f32 %v1987_v33, %v1947_v38  ;;  %v1949_v9 = vadd.f32 %v1948_v39, %v1908_v36 }
 0x205   :  { %v1950_v52 = vpop.f32.mrf.mxu0 }
 0x206   :  { %v1991_v41 = vpop.f32.mrf.mxu1  ;;  %v1990_v20 = vadd.f32 %v1989_v8, %v1949_v9  ;;  %v1996_v42 = vmax.f32 %v1988_v49, 0.0 }
 0x207   :  { %v1951_v21 = vpop.f32.mrf.mxu0 }
 0x208   :  { %v1992_v43 = vpop.f32.mrf.mxu1  ;;  %v1997_v44 = vmax.f32 %v1990_v20, 0.0  ;;  %v2000_v29 = vpack.c.bf16 %v1996_v42, %v1996_v42 }
 0x20a   :  { %v2001_v37 = vpack.c.bf16 %v1997_v44, %v1997_v44 }
 0x20c   :  { %2471 = vmatprep.mubr.bf16.mxu1 %v2001_v37 }
 0x20d   :  { %2472 = vmatmul.mubr.bf16.vlgmr.msra.gmra.mxu1 %v2000_v29 }
 0x24d   :  { %v2432_v40 = vpop.f32.mrf.mxu0 }
 0x24e   :  { %v2433_v54 = vadd.f32 %v2432_v40, %v2071_v32 }
 0x24f   :  { %v2434_v47 = vpop.f32.mrf.mxu0 }
 0x250   :  { %v2435_v56 = vadd.f32 %v2434_v47, %v2075_v53 }
 0x251   :  { %v2436_v48 = vpop.f32.mrf.mxu0 }
 0x253   :  { %v2437_v34 = vpop.f32.mrf.mxu0 }
 0x2cd   :  { %v2473_v55 = vpop.f32.mrf.mxu1 }
 0x2ce   :  { %v2474_v57 = vadd.f32 %v2473_v55, %v2433_v54 }
 0x2cf   :  { %v2475_v35 = vpop.f32.mrf.mxu1 }
 0x2d0   :  { %v2476_v58 = vadd.f32 %v2475_v35, %v2435_v56  ;;  %v2480_v59 = vmax.f32 %v2474_v57, 0.0 }
 0x2d1   :  { %v2477_v60 = vpop.f32.mrf.mxu1 }
 0x2d2   :  { %v2481_v61 = vmax.f32 %v2476_v58, 0.0  ;;  %v2482_v0 = vpack.c.bf16 %v2480_v59, %v2480_v59 }
 0x2d3   :  { %v2478_v62 = vpop.f32.mrf.mxu1 }
 0x2d4   :  { %v2483_v63 = vpack.c.bf16 %v2481_v61, %v2481_v61 }
 0x2d6   :  { %2651 = vmatprep.mubr.bf16.mxu0 %v2483_v63 }
 0x2d7   :  { %2652 = vmatmul.mubr.bf16.vlgmr.msra.gmra.mxu0 %v2482_v0 }
 0x397   :  { %v3032_v1 = vpop.f32.mrf.mxu0 }
 0x399   :  { %v3033_v28 = vpop.f32.mrf.mxu0 }
 0x39a   :  { %v3034_v30 = vadd.f32 %v3033_v28, %v3032_v1 }
 0x39b   :  { %v3035_v2 = vpop.f32.mrf.mxu0 }
 0x39c   :  { %v2654_v3 = vadd.f32 %v3034_v30, %v2999_v23 }
 0x39d   :  { %v3036_v4 = vpop.f32.mrf.mxu0 }
 0x39e   :  { %3546 = vtanh.f32 %v2654_v3 }
 0x3ab   :  { %v3547_v5 = vpop.eup %3546 }
 0x3ac   :  { %2661 = vst.msk [vmem:[#allocation11] sm:$0xff] %vm2660_vm0, %v3547_v5 }
 0x3ad   :  { %3659 = shalt.err (!%p3656_p1)
}
 0x3ae   :  { %2671 = dma.vmem_to_hbm [thread:$0]  %s2669_s8, 128, %s3823_s7, [#allocation4]  }
 0x3af   :  { %3674 = dma.done.wait [#allocation4], 128  }
 0x3b0   :  { %3675 = vsyncadd [#allocation4], 4294967168 }
 0x3b1   :  { %2675 = vsyncpa [#allocation3], 1 }
 0x3b2   :  { %2676 = vsyncpa [#allocation6], 1 }
 0x3b3   :  { %2677 = vsyncpa [#allocation9], 1 }
 0x3b4   :  { %2678 = vsyncpa [#allocation4], 1 }

</bundles_post_ra>
